<compile_context>
chip_gen: v7x
topology: tpu7x:2x2x1
jax: 0.10.0
libtpu: 0.0.40
codegen_flags: <defaults>
</compile_context>

<pallas_src>
import functools

import jax
import jax.numpy as jnp
from jax.experimental import pallas as pl
from jax.experimental.pallas import tpu as pltpu


def _nowcaster_kernel(x_ref, inv_ref,
                      wex_ref, wei_ref, be_ref, wl_ref, bl_ref, wd_ref, bd_ref,
                      out_ref, *, n_steps, in_steps, c, c_inv):
    # Hoisted weight / bias loads (tiny, block index constant across the grid).
    wex = wex_ref[...]                       # (hidden, in_steps*C)
    wei = wei_ref[...]                       # (hidden, in_steps*C_inv)
    be = be_ref[...]                         # (hidden, 1)
    wl = wl_ref[...]                         # (hidden, hidden)
    bl = bl_ref[...]                         # (hidden, 1)
    wd = wd_ref[...]                         # (C, hidden)
    bd = bd_ref[...]                         # (C, 1)

    # Per-time-slab encoder weights for the autoregressive state (static
    # slices of a tiny value, hoisted out of the step loop).
    wex_slabs = [wex[:, t * c:(t + 1) * c] for t in range(in_steps)]

    # Hoist the full inv tile; per-step windows overlap so slice the value.
    inv_all = inv_ref[...].astype(jnp.float32)       # (T*C_inv, tile_n)

    # Autoregressive state: list of (C, tile_n) slabs (oldest time first),
    # carried as traced values across the statically unrolled loop.
    x_all = x_ref[...].astype(jnp.float32)           # (in_steps*C, tile_n)
    state = [x_all[t * c:(t + 1) * c, :] for t in range(in_steps)]

    for i in range(n_steps):                 # static unroll: n_steps is small
        # encoder: split-weight version of  we.T @ cat(x, inv_window)
        inv_win = inv_all[i * c_inv:(i + in_steps) * c_inv, :]
        pre = jnp.dot(wei, inv_win, preferred_element_type=jnp.float32) + be
        for t in range(in_steps):
            pre = pre + jnp.dot(wex_slabs[t], state[t],
                                preferred_element_type=jnp.float32)
        h = jax.nn.gelu(pre, approximate=True)

        # latent_model
        h = jax.nn.gelu(
            jnp.dot(wl, h, preferred_element_type=jnp.float32) + bl,
            approximate=True)

        # decoder -> (C, tile_n), lane-dense
        y = jnp.dot(wd, h, preferred_element_type=jnp.float32) + bd

        # yhat[:, :, i:i+1] = z  (lane-dense store, static sublane slice)
        out_ref[i * c:(i + 1) * c, :] = y.astype(out_ref.dtype)

        if i < n_steps - 1:
            # x = cat((x[:, :, -1:], z), dim=2): shift-register update, free
            # at trace time (no data movement).
            state = state[1:] + [y]


def nowcaster_forward(x, inv, params, *, in_steps, n_steps=1, tile_n=2048,
                      activation_dtype=None):
    """x: (B, C, in_steps, H, W); inv: (B, C_inv, T_inv, H, W)."""
    B, C, Tx, H, W = x.shape
    assert Tx == in_steps
    # The reference autoregressive update (x[:, :, -1:] ++ z) only keeps the
    # input at in_steps time steps when in_steps == 2.
    assert in_steps == 2, "Nowcaster autoregressive update assumes in_steps == 2"
    _, C_inv, T_inv, _, _ = inv.shape
    n_steps = min(n_steps, T_inv - in_steps + 1)
    assert n_steps >= 1

    # Only n_steps + in_steps - 1 time steps of inv are ever read.
    T_used = n_steps + in_steps - 1
    inv = inv[:, :, :T_used]

    N = B * H * W
    # Feature-major / position-minor: rows = time-major channel-minor features,
    # cols = flattened (b, h, w) positions (lane axis).
    x_feat = jnp.transpose(x, (2, 1, 0, 3, 4)).reshape(in_steps * C, N)
    inv_feat = jnp.transpose(inv, (2, 1, 0, 3, 4)).reshape(T_used * C_inv, N)
    if activation_dtype is not None:
        # Optional bf16 storage of activations (halves HBM reads on v6e/v7x);
        # all elementwise math stays f32 inside the kernel.
        x_feat = x_feat.astype(activation_dtype)
        inv_feat = inv_feat.astype(activation_dtype)

    # Choose the lane-tile: pad N to 128, cap by requested tile_n, and keep the
    # grid >= 2 steps when possible so v7x's two TensorCores both get work.
    n_pad128 = pl.cdiv(N, 128) * 128
    tile_n = min(tile_n, n_pad128)
    if n_pad128 >= 256:
        tile_n = min(tile_n, pl.cdiv(n_pad128 // 2, 128) * 128)
    grid_n = pl.cdiv(N, tile_n)
    N_pad = grid_n * tile_n
    if N_pad != N:
        x_feat = jnp.pad(x_feat, ((0, 0), (0, N_pad - N)))
        inv_feat = jnp.pad(inv_feat, ((0, 0), (0, N_pad - N)))

    we, be, wl, bl, wd, bd = params
    hidden = we.shape[1]
    f_x = in_steps * C
    # Pre-transpose / pre-split weights for the feature-major layout.
    we_T = we.T                  # (hidden, (C+C_inv)*in_steps)
    wex = we_T[:, :f_x]          # (hidden, in_steps*C)       -> x features
    wei = we_T[:, f_x:]          # (hidden, in_steps*C_inv)   -> inv features
    be_c = be.reshape(hidden, 1)
    wl_T = wl.T                  # (hidden, hidden)
    bl_c = bl.reshape(hidden, 1)
    wd_T = wd.T                  # (C, hidden)
    bd_c = bd.reshape(C, 1)

    F_out = n_steps * C
    kernel = functools.partial(_nowcaster_kernel, n_steps=n_steps,
                               in_steps=in_steps, c=C, c_inv=C_inv)

    def wspec(arr):
        # Full-array block; constant block index -> stays resident in VMEM.
        return pl.BlockSpec(arr.shape, lambda i: (0, 0))

    out = pl.pallas_call(
        kernel,
        out_shape=jax.ShapeDtypeStruct((F_out, N_pad), x.dtype),
        grid_spec=pltpu.PrefetchScalarGridSpec(
            num_scalar_prefetch=0,
            grid=(grid_n,),
            in_specs=[
                pl.BlockSpec((in_steps * C, tile_n), lambda i: (0, i)),
                pl.BlockSpec((T_used * C_inv, tile_n), lambda i: (0, i)),
                wspec(wex), wspec(wei), wspec(be_c),
                wspec(wl_T), wspec(bl_c),
                wspec(wd_T), wspec(bd_c),
            ],
            out_specs=pl.BlockSpec((F_out, tile_n), lambda i: (0, i)),
        ),
        compiler_params=pltpu.CompilerParams(
            dimension_semantics=("parallel",)),
    )(x_feat, inv_feat, wex, wei, be_c, wl_T, bl_c, wd_T, bd_c)

    out = out[:, :N]
    # (n_steps*C, N) -> (B, C, n_steps, H, W)  (matches the PyTorch yhat layout)
    return out.reshape(n_steps, C, B, H, W).transpose(2, 1, 0, 3, 4)


def nowcaster_ref(x, inv, params, *, in_steps, n_steps):
    """Pure-JAX reference with identical semantics (correctness check)."""
    we, be, wl, bl, wd, bd = params
    B, C, _, H, W = x.shape
    _, C_inv, T_inv, _, _ = inv.shape
    n_steps = min(n_steps, T_inv - in_steps + 1)
    xf = jnp.transpose(x, (0, 3, 4, 2, 1)).reshape(-1, in_steps * C)
    invf = jnp.transpose(inv, (0, 3, 4, 2, 1)).reshape(-1, T_inv * C_inv)
    outs = []
    for i in range(n_steps):
        z0 = jnp.concatenate([xf, invf[:, i * C_inv:(i + in_steps) * C_inv]], axis=1)
        h = jax.nn.gelu(z0 @ we + be, approximate=True)
        h = jax.nn.gelu(h @ wl + bl, approximate=True)
        y = h @ wd + bd
        outs.append(y)
        xf = jnp.concatenate([xf[:, (in_steps - 1) * C:], y], axis=1)
    out = jnp.concatenate(outs, axis=1)
    return out.reshape(B, H, W, n_steps, C).transpose(0, 4, 3, 1, 2)


def init_params(key, c, c_inv, in_steps, hidden):
    f_in = (c + c_inv) * in_steps
    k = jax.random.split(key, 6)
    we = jax.random.normal(k[0], (f_in, hidden), jnp.float32) / jnp.sqrt(f_in)
    be = jax.random.normal(k[1], (1, hidden), jnp.float32) * 0.01
    wl = jax.random.normal(k[2], (hidden, hidden), jnp.float32) / jnp.sqrt(hidden)
    bl = jax.random.normal(k[3], (1, hidden), jnp.float32) * 0.01
    wd = jax.random.normal(k[4], (hidden, c), jnp.float32) / jnp.sqrt(hidden)
    bd = jax.random.normal(k[5], (1, c), jnp.float32) * 0.01
    return (we, be, wl, bl, wd, bd)


if __name__ == "__main__":
    # TODO(synk): encoder / latent_model / decoder are injected nn.Modules in
    # the original; they are modeled here as point-wise conv MLPs (GELU).
    B, C, C_inv = 2, 4, 2
    in_steps, T_inv = 2, 4
    H = W = 16
    hidden = 32
    n_steps_req = 3  # clamped to min(3, T_inv - in_steps + 1) = 3

    key = jax.random.PRNGKey(0)
    kx, kinv, kp = jax.random.split(key, 3)
    x = jax.random.normal(kx, (B, C, in_steps, H, W), jnp.float32)
    inv = jax.random.normal(kinv, (B, C_inv, T_inv, H, W), jnp.float32)
    params = init_params(kp, C, C_inv, in_steps, hidden)

    yhat = nowcaster_forward(x, inv, params, in_steps=in_steps,
                             n_steps=n_steps_req)
    yhat = jax.block_until_ready(yhat)

    n_steps = min(n_steps_req, T_inv - in_steps + 1)
    assert yhat.shape == (B, C, n_steps, H, W), yhat.shape
    assert yhat.dtype == x.dtype

    y_ref = nowcaster_ref(x, inv, params, in_steps=in_steps, n_steps=n_steps_req)
    if not jnp.allclose(yhat, y_ref, atol=2e-2, rtol=2e-2):
        raise AssertionError("Pallas kernel output does not match reference")

    print("KERNEL_OK")
</pallas_src>

<mosaic_0001>
module attributes {stable_mosaic.version = 11 : i64} {
  func.func @_nowcaster_kernel(%arg0: i32, %arg1: memref<8x256xf32, #tpu.memory_space<vmem>>, %arg2: memref<8x256xf32, #tpu.memory_space<vmem>>, %arg3: memref<32x8xf32, #tpu.memory_space<vmem>>, %arg4: memref<32x4xf32, #tpu.memory_space<vmem>>, %arg5: memref<32x1xf32, #tpu.memory_space<vmem>>, %arg6: memref<32x32xf32, #tpu.memory_space<vmem>>, %arg7: memref<32x1xf32, #tpu.memory_space<vmem>>, %arg8: memref<4x32xf32, #tpu.memory_space<vmem>>, %arg9: memref<4x1xf32, #tpu.memory_space<vmem>>, %arg10: memref<12x256xf32, #tpu.memory_space<vmem>>) attributes {dimension_semantics = [#tpu.dimension_semantics<parallel>], iteration_bounds = array<i64: 2>, scalar_prefetch = 0 : i64, scratch_operands = 0 : i64, tpu.core_type = #tpu.core_type<tc>, window_params = [{transform_indices = @transform_0, window_bounds = array<i64: 8, 256>}, {transform_indices = @transform_1, window_bounds = array<i64: 8, 256>}, {pipeline_mode = #tpu.pipeline_mode<synchronous>, transform_indices = @transform_2, window_bounds = array<i64: 32, 8>}, {pipeline_mode = #tpu.pipeline_mode<synchronous>, transform_indices = @transform_3, window_bounds = array<i64: 32, 4>}, {pipeline_mode = #tpu.pipeline_mode<synchronous>, transform_indices = @transform_4, window_bounds = array<i64: 32, 1>}, {pipeline_mode = #tpu.pipeline_mode<synchronous>, transform_indices = @transform_5, window_bounds = array<i64: 32, 32>}, {pipeline_mode = #tpu.pipeline_mode<synchronous>, transform_indices = @transform_6, window_bounds = array<i64: 32, 1>}, {pipeline_mode = #tpu.pipeline_mode<synchronous>, transform_indices = @transform_7, window_bounds = array<i64: 4, 32>}, {pipeline_mode = #tpu.pipeline_mode<synchronous>, transform_indices = @transform_8, window_bounds = array<i64: 4, 1>}, {transform_indices = @transform_9, window_bounds = array<i64: 12, 256>}]} {
    %c0 = arith.constant 0 : index
    %c0_0 = arith.constant 0 : index
    %0 = vector.load %arg3[%c0, %c0_0] : memref<32x8xf32, #tpu.memory_space<vmem>>, vector<32x8xf32>
    %c0_1 = arith.constant 0 : index
    %c0_2 = arith.constant 0 : index
    %1 = vector.load %arg4[%c0_1, %c0_2] : memref<32x4xf32, #tpu.memory_space<vmem>>, vector<32x4xf32>
    %c0_3 = arith.constant 0 : index
    %c0_4 = arith.constant 0 : index
    %2 = vector.load %arg5[%c0_3, %c0_4] : memref<32x1xf32, #tpu.memory_space<vmem>>, vector<32x1xf32>
    %c0_5 = arith.constant 0 : index
    %c0_6 = arith.constant 0 : index
    %3 = vector.load %arg6[%c0_5, %c0_6] : memref<32x32xf32, #tpu.memory_space<vmem>>, vector<32x32xf32>
    %c0_7 = arith.constant 0 : index
    %c0_8 = arith.constant 0 : index
    %4 = vector.load %arg7[%c0_7, %c0_8] : memref<32x1xf32, #tpu.memory_space<vmem>>, vector<32x1xf32>
    %c0_9 = arith.constant 0 : index
    %c0_10 = arith.constant 0 : index
    %5 = vector.load %arg8[%c0_9, %c0_10] : memref<4x32xf32, #tpu.memory_space<vmem>>, vector<4x32xf32>
    %c0_11 = arith.constant 0 : index
    %c0_12 = arith.constant 0 : index
    %6 = vector.load %arg9[%c0_11, %c0_12] : memref<4x1xf32, #tpu.memory_space<vmem>>, vector<4x1xf32>
    %7 = vector.extract_strided_slice %0 {offsets = [0, 0], sizes = [32, 4], strides = [1, 1]} : vector<32x8xf32> to vector<32x4xf32>
    %8 = vector.extract_strided_slice %0 {offsets = [0, 4], sizes = [32, 4], strides = [1, 1]} : vector<32x8xf32> to vector<32x4xf32>
    %c0_13 = arith.constant 0 : index
    %c0_14 = arith.constant 0 : index
    %9 = vector.load %arg2[%c0_13, %c0_14] : memref<8x256xf32, #tpu.memory_space<vmem>>, vector<8x256xf32>
    %c0_15 = arith.constant 0 : index
    %c0_16 = arith.constant 0 : index
    %10 = vector.load %arg1[%c0_15, %c0_16] : memref<8x256xf32, #tpu.memory_space<vmem>>, vector<8x256xf32>
    %11 = vector.extract_strided_slice %10 {offsets = [0, 0], sizes = [4, 256], strides = [1, 1]} : vector<8x256xf32> to vector<4x256xf32>
    %12 = vector.extract_strided_slice %10 {offsets = [4, 0], sizes = [4, 256], strides = [1, 1]} : vector<8x256xf32> to vector<4x256xf32>
    %13 = vector.extract_strided_slice %9 {offsets = [0, 0], sizes = [4, 256], strides = [1, 1]} : vector<8x256xf32> to vector<4x256xf32>
    %cst = arith.constant dense<0.000000e+00> : vector<32x256xf32>
    %14 = tpu.matmul %1, %13, %cst {dimension_numbers = #tpu.dot_dimension_numbers<[1], [0], [0], [1], [0, 0, 1, 1], [], []>} : vector<32x4xf32>, vector<4x256xf32>, vector<32x256xf32> -> vector<32x256xf32>
    %15 = vector.broadcast %2 : vector<32x1xf32> to vector<32x256xf32>
    %16 = arith.addf %14, %15 : vector<32x256xf32>
    %cst_17 = arith.constant dense<0.000000e+00> : vector<32x256xf32>
    %17 = tpu.matmul %7, %11, %cst_17 {dimension_numbers = #tpu.dot_dimension_numbers<[1], [0], [0], [1], [0, 0, 1, 1], [], []>} : vector<32x4xf32>, vector<4x256xf32>, vector<32x256xf32> -> vector<32x256xf32>
    %18 = arith.addf %16, %17 : vector<32x256xf32>
    %cst_18 = arith.constant dense<0.000000e+00> : vector<32x256xf32>
    %19 = tpu.matmul %8, %12, %cst_18 {dimension_numbers = #tpu.dot_dimension_numbers<[1], [0], [0], [1], [0, 0, 1, 1], [], []>} : vector<32x4xf32>, vector<4x256xf32>, vector<32x256xf32> -> vector<32x256xf32>
    %20 = arith.addf %18, %19 : vector<32x256xf32>
    %21 = arith.mulf %20, %20 : vector<32x256xf32>
    %22 = arith.mulf %20, %21 : vector<32x256xf32>
    %cst_19 = arith.constant 4.471500e-02 : f32
    %23 = vector.broadcast %cst_19 : f32 to vector<32x256xf32>
    %24 = arith.mulf %23, %22 : vector<32x256xf32>
    %25 = arith.addf %20, %24 : vector<32x256xf32>
    %cst_20 = arith.constant 0.797884583 : f32
    %26 = vector.broadcast %cst_20 : f32 to vector<32x256xf32>
    %27 = arith.mulf %26, %25 : vector<32x256xf32>
    %28 = math.tanh %27 : vector<32x256xf32>
    %cst_21 = arith.constant 1.000000e+00 : f32
    %29 = vector.broadcast %cst_21 : f32 to vector<32x256xf32>
    %30 = arith.addf %29, %28 : vector<32x256xf32>
    %cst_22 = arith.constant 5.000000e-01 : f32
    %31 = vector.broadcast %cst_22 : f32 to vector<32x256xf32>
    %32 = arith.mulf %31, %30 : vector<32x256xf32>
    %33 = arith.mulf %20, %32 : vector<32x256xf32>
    %cst_23 = arith.constant dense<0.000000e+00> : vector<32x256xf32>
    %34 = tpu.matmul %3, %33, %cst_23 {dimension_numbers = #tpu.dot_dimension_numbers<[1], [0], [0], [1], [0, 0, 1, 1], [], []>} : vector<32x32xf32>, vector<32x256xf32>, vector<32x256xf32> -> vector<32x256xf32>
    %35 = vector.broadcast %4 : vector<32x1xf32> to vector<32x256xf32>
    %36 = arith.addf %34, %35 : vector<32x256xf32>
    %37 = arith.mulf %36, %36 : vector<32x256xf32>
    %38 = arith.mulf %36, %37 : vector<32x256xf32>
    %cst_24 = arith.constant 4.471500e-02 : f32
    %39 = vector.broadcast %cst_24 : f32 to vector<32x256xf32>
    %40 = arith.mulf %39, %38 : vector<32x256xf32>
    %41 = arith.addf %36, %40 : vector<32x256xf32>
    %cst_25 = arith.constant 0.797884583 : f32
    %42 = vector.broadcast %cst_25 : f32 to vector<32x256xf32>
    %43 = arith.mulf %42, %41 : vector<32x256xf32>
    %44 = math.tanh %43 : vector<32x256xf32>
    %cst_26 = arith.constant 1.000000e+00 : f32
    %45 = vector.broadcast %cst_26 : f32 to vector<32x256xf32>
    %46 = arith.addf %45, %44 : vector<32x256xf32>
    %cst_27 = arith.constant 5.000000e-01 : f32
    %47 = vector.broadcast %cst_27 : f32 to vector<32x256xf32>
    %48 = arith.mulf %47, %46 : vector<32x256xf32>
    %49 = arith.mulf %36, %48 : vector<32x256xf32>
    %cst_28 = arith.constant dense<0.000000e+00> : vector<4x256xf32>
    %50 = tpu.matmul %5, %49, %cst_28 {dimension_numbers = #tpu.dot_dimension_numbers<[1], [0], [0], [1], [0, 0, 1, 1], [], []>} : vector<4x32xf32>, vector<32x256xf32>, vector<4x256xf32> -> vector<4x256xf32>
    %51 = vector.broadcast %6 : vector<4x1xf32> to vector<4x256xf32>
    %52 = arith.addf %50, %51 : vector<4x256xf32>
    %c0_29 = arith.constant 0 : index
    %c0_30 = arith.constant 0 : index
    %53 = vector.load %arg10[%c0_29, %c0_30] : memref<12x256xf32, #tpu.memory_space<vmem>>, vector<4x256xf32>
    tpu.vector_store %arg10[%c0_29, %c0_30], %52 {strides = array<i32>} : memref<12x256xf32, #tpu.memory_space<vmem>>, vector<4x256xf32>,
    %54 = vector.extract_strided_slice %9 {offsets = [2, 0], sizes = [4, 256], strides = [1, 1]} : vector<8x256xf32> to vector<4x256xf32>
    %cst_31 = arith.constant dense<0.000000e+00> : vector<32x256xf32>
    %55 = tpu.matmul %1, %54, %cst_31 {dimension_numbers = #tpu.dot_dimension_numbers<[1], [0], [0], [1], [0, 0, 1, 1], [], []>} : vector<32x4xf32>, vector<4x256xf32>, vector<32x256xf32> -> vector<32x256xf32>
    %56 = vector.broadcast %2 : vector<32x1xf32> to vector<32x256xf32>
    %57 = arith.addf %55, %56 : vector<32x256xf32>
    %cst_32 = arith.constant dense<0.000000e+00> : vector<32x256xf32>
    %58 = tpu.matmul %7, %12, %cst_32 {dimension_numbers = #tpu.dot_dimension_numbers<[1], [0], [0], [1], [0, 0, 1, 1], [], []>} : vector<32x4xf32>, vector<4x256xf32>, vector<32x256xf32> -> vector<32x256xf32>
    %59 = arith.addf %57, %58 : vector<32x256xf32>
    %cst_33 = arith.constant dense<0.000000e+00> : vector<32x256xf32>
    %60 = tpu.matmul %8, %52, %cst_33 {dimension_numbers = #tpu.dot_dimension_numbers<[1], [0], [0], [1], [0, 0, 1, 1], [], []>} : vector<32x4xf32>, vector<4x256xf32>, vector<32x256xf32> -> vector<32x256xf32>
    %61 = arith.addf %59, %60 : vector<32x256xf32>
    %62 = arith.mulf %61, %61 : vector<32x256xf32>
    %63 = arith.mulf %61, %62 : vector<32x256xf32>
    %cst_34 = arith.constant 4.471500e-02 : f32
    %64 = vector.broadcast %cst_34 : f32 to vector<32x256xf32>
    %65 = arith.mulf %64, %63 : vector<32x256xf32>
    %66 = arith.addf %61, %65 : vector<32x256xf32>
    %cst_35 = arith.constant 0.797884583 : f32
    %67 = vector.broadcast %cst_35 : f32 to vector<32x256xf32>
    %68 = arith.mulf %67, %66 : vector<32x256xf32>
    %69 = math.tanh %68 : vector<32x256xf32>
    %cst_36 = arith.constant 1.000000e+00 : f32
    %70 = vector.broadcast %cst_36 : f32 to vector<32x256xf32>
    %71 = arith.addf %70, %69 : vector<32x256xf32>
    %cst_37 = arith.constant 5.000000e-01 : f32
    %72 = vector.broadcast %cst_37 : f32 to vector<32x256xf32>
    %73 = arith.mulf %72, %71 : vector<32x256xf32>
    %74 = arith.mulf %61, %73 : vector<32x256xf32>
    %cst_38 = arith.constant dense<0.000000e+00> : vector<32x256xf32>
    %75 = tpu.matmul %3, %74, %cst_38 {dimension_numbers = #tpu.dot_dimension_numbers<[1], [0], [0], [1], [0, 0, 1, 1], [], []>} : vector<32x32xf32>, vector<32x256xf32>, vector<32x256xf32> -> vector<32x256xf32>
    %76 = vector.broadcast %4 : vector<32x1xf32> to vector<32x256xf32>
    %77 = arith.addf %75, %76 : vector<32x256xf32>
    %78 = arith.mulf %77, %77 : vector<32x256xf32>
    %79 = arith.mulf %77, %78 : vector<32x256xf32>
    %cst_39 = arith.constant 4.471500e-02 : f32
    %80 = vector.broadcast %cst_39 : f32 to vector<32x256xf32>
    %81 = arith.mulf %80, %79 : vector<32x256xf32>
    %82 = arith.addf %77, %81 : vector<32x256xf32>
    %cst_40 = arith.constant 0.797884583 : f32
    %83 = vector.broadcast %cst_40 : f32 to vector<32x256xf32>
    %84 = arith.mulf %83, %82 : vector<32x256xf32>
    %85 = math.tanh %84 : vector<32x256xf32>
    %cst_41 = arith.constant 1.000000e+00 : f32
    %86 = vector.broadcast %cst_41 : f32 to vector<32x256xf32>
    %87 = arith.addf %86, %85 : vector<32x256xf32>
    %cst_42 = arith.constant 5.000000e-01 : f32
    %88 = vector.broadcast %cst_42 : f32 to vector<32x256xf32>
    %89 = arith.mulf %88, %87 : vector<32x256xf32>
    %90 = arith.mulf %77, %89 : vector<32x256xf32>
    %cst_43 = arith.constant dense<0.000000e+00> : vector<4x256xf32>
    %91 = tpu.matmul %5, %90, %cst_43 {dimension_numbers = #tpu.dot_dimension_numbers<[1], [0], [0], [1], [0, 0, 1, 1], [], []>} : vector<4x32xf32>, vector<32x256xf32>, vector<4x256xf32> -> vector<4x256xf32>
    %92 = vector.broadcast %6 : vector<4x1xf32> to vector<4x256xf32>
    %93 = arith.addf %91, %92 : vector<4x256xf32>
    %c4 = arith.constant 4 : index
    %c0_44 = arith.constant 0 : index
    %94 = vector.load %arg10[%c4, %c0_44] : memref<12x256xf32, #tpu.memory_space<vmem>>, vector<4x256xf32>
    tpu.vector_store %arg10[%c4, %c0_44], %93 {strides = array<i32>} : memref<12x256xf32, #tpu.memory_space<vmem>>, vector<4x256xf32>,
    %95 = vector.extract_strided_slice %9 {offsets = [4, 0], sizes = [4, 256], strides = [1, 1]} : vector<8x256xf32> to vector<4x256xf32>
    %cst_45 = arith.constant dense<0.000000e+00> : vector<32x256xf32>
    %96 = tpu.matmul %1, %95, %cst_45 {dimension_numbers = #tpu.dot_dimension_numbers<[1], [0], [0], [1], [0, 0, 1, 1], [], []>} : vector<32x4xf32>, vector<4x256xf32>, vector<32x256xf32> -> vector<32x256xf32>
    %97 = vector.broadcast %2 : vector<32x1xf32> to vector<32x256xf32>
    %98 = arith.addf %96, %97 : vector<32x256xf32>
    %cst_46 = arith.constant dense<0.000000e+00> : vector<32x256xf32>
    %99 = tpu.matmul %7, %52, %cst_46 {dimension_numbers = #tpu.dot_dimension_numbers<[1], [0], [0], [1], [0, 0, 1, 1], [], []>} : vector<32x4xf32>, vector<4x256xf32>, vector<32x256xf32> -> vector<32x256xf32>
    %100 = arith.addf %98, %99 : vector<32x256xf32>
    %cst_47 = arith.constant dense<0.000000e+00> : vector<32x256xf32>
    %101 = tpu.matmul %8, %93, %cst_47 {dimension_numbers = #tpu.dot_dimension_numbers<[1], [0], [0], [1], [0, 0, 1, 1], [], []>} : vector<32x4xf32>, vector<4x256xf32>, vector<32x256xf32> -> vector<32x256xf32>
    %102 = arith.addf %100, %101 : vector<32x256xf32>
    %103 = arith.mulf %102, %102 : vector<32x256xf32>
    %104 = arith.mulf %102, %103 : vector<32x256xf32>
    %cst_48 = arith.constant 4.471500e-02 : f32
    %105 = vector.broadcast %cst_48 : f32 to vector<32x256xf32>
    %106 = arith.mulf %105, %104 : vector<32x256xf32>
    %107 = arith.addf %102, %106 : vector<32x256xf32>
    %cst_49 = arith.constant 0.797884583 : f32
    %108 = vector.broadcast %cst_49 : f32 to vector<32x256xf32>
    %109 = arith.mulf %108, %107 : vector<32x256xf32>
    %110 = math.tanh %109 : vector<32x256xf32>
    %cst_50 = arith.constant 1.000000e+00 : f32
    %111 = vector.broadcast %cst_50 : f32 to vector<32x256xf32>
    %112 = arith.addf %111, %110 : vector<32x256xf32>
    %cst_51 = arith.constant 5.000000e-01 : f32
    %113 = vector.broadcast %cst_51 : f32 to vector<32x256xf32>
    %114 = arith.mulf %113, %112 : vector<32x256xf32>
    %115 = arith.mulf %102, %114 : vector<32x256xf32>
    %cst_52 = arith.constant dense<0.000000e+00> : vector<32x256xf32>
    %116 = tpu.matmul %3, %115, %cst_52 {dimension_numbers = #tpu.dot_dimension_numbers<[1], [0], [0], [1], [0, 0, 1, 1], [], []>} : vector<32x32xf32>, vector<32x256xf32>, vector<32x256xf32> -> vector<32x256xf32>
    %117 = vector.broadcast %4 : vector<32x1xf32> to vector<32x256xf32>
    %118 = arith.addf %116, %117 : vector<32x256xf32>
    %119 = arith.mulf %118, %118 : vector<32x256xf32>
    %120 = arith.mulf %118, %119 : vector<32x256xf32>
    %cst_53 = arith.constant 4.471500e-02 : f32
    %121 = vector.broadcast %cst_53 : f32 to vector<32x256xf32>
    %122 = arith.mulf %121, %120 : vector<32x256xf32>
    %123 = arith.addf %118, %122 : vector<32x256xf32>
    %cst_54 = arith.constant 0.797884583 : f32
    %124 = vector.broadcast %cst_54 : f32 to vector<32x256xf32>
    %125 = arith.mulf %124, %123 : vector<32x256xf32>
    %126 = math.tanh %125 : vector<32x256xf32>
    %cst_55 = arith.constant 1.000000e+00 : f32
    %127 = vector.broadcast %cst_55 : f32 to vector<32x256xf32>
    %128 = arith.addf %127, %126 : vector<32x256xf32>
    %cst_56 = arith.constant 5.000000e-01 : f32
    %129 = vector.broadcast %cst_56 : f32 to vector<32x256xf32>
    %130 = arith.mulf %129, %128 : vector<32x256xf32>
    %131 = arith.mulf %118, %130 : vector<32x256xf32>
    %cst_57 = arith.constant dense<0.000000e+00> : vector<4x256xf32>
    %132 = tpu.matmul %5, %131, %cst_57 {dimension_numbers = #tpu.dot_dimension_numbers<[1], [0], [0], [1], [0, 0, 1, 1], [], []>} : vector<4x32xf32>, vector<32x256xf32>, vector<4x256xf32> -> vector<4x256xf32>
    %133 = vector.broadcast %6 : vector<4x1xf32> to vector<4x256xf32>
    %134 = arith.addf %132, %133 : vector<4x256xf32>
    %c8 = arith.constant 8 : index
    %c0_58 = arith.constant 0 : index
    %135 = vector.load %arg10[%c8, %c0_58] : memref<12x256xf32, #tpu.memory_space<vmem>>, vector<4x256xf32>
    tpu.vector_store %arg10[%c8, %c0_58], %134 {strides = array<i32>} : memref<12x256xf32, #tpu.memory_space<vmem>>, vector<4x256xf32>,
    return
  }
  func.func @transform_0(%arg0: i32) -> (i32, i32) {
    %c0_i32 = arith.constant 0 : i32
    %c0_i32_0 = arith.constant 0 : i32
    return %c0_i32, %arg0 : i32, i32
  }
  func.func @transform_1(%arg0: i32) -> (i32, i32) {
    %c0_i32 = arith.constant 0 : i32
    %c0_i32_0 = arith.constant 0 : i32
    return %c0_i32, %arg0 : i32, i32
  }
  func.func @transform_2(%arg0: i32) -> (i32, i32) {
    %c0_i32 = arith.constant 0 : i32
    %c0_i32_0 = arith.constant 0 : i32
    %c0_i32_1 = arith.constant 0 : i32
    return %c0_i32, %c0_i32_0 : i32, i32
  }
  func.func @transform_3(%arg0: i32) -> (i32, i32) {
    %c0_i32 = arith.constant 0 : i32
    %c0_i32_0 = arith.constant 0 : i32
    %c0_i32_1 = arith.constant 0 : i32
    return %c0_i32, %c0_i32_0 : i32, i32
  }
  func.func @transform_4(%arg0: i32) -> (i32, i32) {
    %c0_i32 = arith.constant 0 : i32
    %c0_i32_0 = arith.constant 0 : i32
    %c0_i32_1 = arith.constant 0 : i32
    return %c0_i32, %c0_i32_0 : i32, i32
  }
  func.func @transform_5(%arg0: i32) -> (i32, i32) {
    %c0_i32 = arith.constant 0 : i32
    %c0_i32_0 = arith.constant 0 : i32
    %c0_i32_1 = arith.constant 0 : i32
    return %c0_i32, %c0_i32_0 : i32, i32
  }
  func.func @transform_6(%arg0: i32) -> (i32, i32) {
    %c0_i32 = arith.constant 0 : i32
    %c0_i32_0 = arith.constant 0 : i32
    %c0_i32_1 = arith.constant 0 : i32
    return %c0_i32, %c0_i32_0 : i32, i32
  }
  func.func @transform_7(%arg0: i32) -> (i32, i32) {
    %c0_i32 = arith.constant 0 : i32
    %c0_i32_0 = arith.constant 0 : i32
    %c0_i32_1 = arith.constant 0 : i32
    return %c0_i32, %c0_i32_0 : i32, i32
  }
  func.func @transform_8(%arg0: i32) -> (i32, i32) {
    %c0_i32 = arith.constant 0 : i32
    %c0_i32_0 = arith.constant 0 : i32
    %c0_i32_1 = arith.constant 0 : i32
    return %c0_i32, %c0_i32_0 : i32, i32
  }
  func.func @transform_9(%arg0: i32) -> (i32, i32) {
    %c0_i32 = arith.constant 0 : i32
    %c0_i32_0 = arith.constant 0 : i32
    return %c0_i32, %arg0 : i32, i32
  }
}

</mosaic_0001>

<bundles_post_ra>
// kernel: tpu_custom_call.1
= control target key start
LH: loop header
LB: loop body
LE: loop exit
PB: predicated region body
PF: predicated region fallthrough
CT: control target
= control target key end

     0   :  { %14 = vsyncpa [#allocation3], 0  ;;  %s3694_s0 = inlined_call_operand.vmem [shape: f32[8,512], index: 0, kind: input, shape index: {}]   ;;  %s3695_s1 = inlined_call_operand.vmem [shape: f32[8,512], index: 1, kind: input, shape index: {}]   ;;  %s3696_s2 = inlined_call_operand.vmem [shape: f32[32,8], index: 2, kind: input, shape index: {}]   ;;  %s3697_s3 = inlined_call_operand.vmem [shape: f32[32,4], index: 3, kind: input, shape index: {}]   ;;  %s3698_s4 = inlined_call_operand.vmem [shape: f32[32,1], index: 4, kind: input, shape index: {}]   ;;  %s3699_s5 = inlined_call_operand.vmem [shape: f32[32,32], index: 5, kind: input, shape index: {}]   ;;  %s3700_s6 = inlined_call_operand.vmem [shape: f32[32,1], index: 6, kind: input, shape index: {}]   ;;  %s3701_s7 = inlined_call_operand.vmem [shape: f32[4,32], index: 7, kind: input, shape index: {}]   ;;  %s3702_s8 = inlined_call_operand.vmem [shape: f32[4,1], index: 8, kind: input, shape index: {}]   ;;  %s3703_s9 = inlined_call_operand.hbm [shape: f32[12,512], index: 9, kind: output, shape index: {}]  }
   0x1   :  { %16 = vsyncpa [#allocation3 + $0x1], 0  ;;  %s2869_s30 = smov 0   ;;  %s2871_s10 = smov 0  }
   0x2   :  { %s2873_s11 = smov 0   ;;  %s2875_s12 = smov 0  }
   0x3 LB: > { %s2890_s13 = sadd.s32 4294967295, %s2810_s12   ;;  %s2386_s14 = sadd.s32 4294967294, %s2810_s12   ;;  %s2810_s12 = sphi %s2875_s12, %s3709_s12   ;;  %s2806_s11 = sphi %s2873_s11, %s3708_s11   ;;  %s2802_s10 = sphi %s2871_s10, %s3707_s10   ;;  %s2798_s30 = sphi %s2869_s30, %s3706_s30  }
   0x4   : > { %s2894_s15 = sadd.s32 1, %s2810_s12   ;;  %s228_s16 = sadd.s32 1, %s2806_s11 }
   0x5   : > { %s225_s17 = ssub.s32 %s2810_s12, %s2894_s15  ;;  %p238_p0 = scmp.ne.s32.totalorder %s2806_s11, %s2802_s10 }
   0x6   : > { %p226_p1 = scmp.eq.s32.totalorder %s225_s17, 0  ;;  %p239_p2 = scmp.eq.s32.totalorder %s2890_s13, 1 }
   0x7   : > { %p244_p3 = scmp.ne.s32.totalorder %s2802_s10, %s2798_s30  ;;  %p245_p4 = scmp.eq.s32.totalorder %s2386_s14, 1 }
   0x8   : > { %s2905_s18 = scalar_select %p226_p1, %s2806_s11, %s228_s16  }
   0x9   : > { %p2907_p5 = por %p239_p2, %p238_p0  ;;  %p2911_p6 = por %p245_p4, %p244_p3 }
   0xa   : > { %p2389_p7 = scmp.ge.s32.totalorder %s2810_s12, 1  ;;  %p302_p8 = scmp.lt.s32.totalorder %s2810_s12, 3 }
   0xc   : > { %p303_p9 = pnand %p2389_p7, %p302_p8 }
   0xd   : > { %v2920_v0 = vld [vmem:[%s3696_s2] sm:$0xff] (!%p303_p9)  ;;  %v2925_v1 = vld [vmem:[%s3696_s2 + $0x10] sm:$0xff] (!%p303_p9)  ;;  %s2391_s25 = sshll.u32 (!%p303_p9), %s2890_s13, 1  ;;  %s2812_s26 = smov (!%p303_p9), 124   ;;  %v2933_v2 = vld [vmem:[%s3696_s2 + $0x8] sm:$0xff] (!%p303_p9)  ;;  %v2813_v4 = vmov (!%p303_p9), 0.0  }
   0xe   : > { %306 = sbr.rel (%p303_p9) target bundleno = 2354 (0x932), region = 56  ;;  %626 = vrot.lane.b32.xlu0 (!%p303_p9), %v2920_v0, %s2812_s26  ;;  %630 = vrot.lane.b32.xlu1 (!%p303_p9), %v2925_v1, %s2812_s26  ;;  %p344_p10 = scmp.lt.s32.totalorder (!%p303_p9), %s2391_s25, 3  ;;  %v2938_v3 = vld [vmem:[%s3696_s2 + $0x18] sm:$0xff] (!%p303_p9)  ;;  %v2814_v5 = vmov (!%p303_p9), 0   ;;  %vm415_vm0 = vcmask (!%p303_p9), 1043456   ;;  %v2955_v6 = vld [vmem:[%s3697_s3] sm:$0xff] (!%p303_p9) }
   0xf   : > { %593 = vmatprep.mubr.f32.mxu0 (!%p303_p9), %v2813_v4  ;;  %486 = vmatprep.mubr.f32.mxu1 (!%p303_p9), %v2813_v4  ;;  %vm402_vm1 = vcmask (!%p303_p9), 31744   ;;  %v365_v13 = vld [vmem:[%s3698_s4 + $0x8] sm:$0xff] (!%p303_p9)  ;;  %v364_v14 = vld [vmem:[%s3698_s4] sm:$0xff] (!%p303_p9)  ;;  %v366_v16 = vld [vmem:[%s3698_s4 + $0x10] sm:$0xff] (!%p303_p9)  ;;  %vm837_vm2 = vcmask (!%p303_p9), 261120   ;;  %s2469_s29 = sshll.u32 (!%p303_p9), %s2890_s13, 8 }
  0x10   : > { %2636 = vset.pattern.permute.xlu1 (!%p303_p9), %v2814_v5  ;;  %2635 = vset.pattern.permute.xlu0 (!%p303_p9), %v2814_v5  ;;  %v2992_v15 = vld [vmem:[%s3697_s3 + $0x8] sm:$0xff] (!%p303_p9)  ;;  %v367_v17 = vld [vmem:[%s3698_s4 + $0x18] sm:$0xff] (!%p303_p9)  ;;  %v3015_v18 = vld [vmem:[%s3697_s3 + $0x10] sm:$0xff] (!%p303_p9)  ;;  %s3646_s17 = scalar_lea.hbm (!%p303_p9), %s3703_s9, %s2469_s29 }
  0x11   : > { %v372_v19 = vld [vmem:[%s3700_s6] sm:$0xff] (!%p303_p9)  ;;  %v373_v20 = vld [vmem:[%s3700_s6 + $0x8] sm:$0xff] (!%p303_p9)  ;;  %v3032_v21 = vld [vmem:[%s3697_s3 + $0x18] sm:$0xff] (!%p303_p9) }
  0x12   : > { %628 = vrot.lane.b32.xlu0 (!%p303_p9), %v2933_v2, %s2812_s26  ;;  %632 = vrot.lane.b32.xlu1 (!%p303_p9), %v2938_v3, %s2812_s26  ;;  %v374_v22 = vld [vmem:[%s3700_s6 + $0x10] sm:$0xff] (!%p303_p9)  ;;  %v375_v23 = vld [vmem:[%s3700_s6 + $0x18] sm:$0xff] (!%p303_p9)  ;;  %s340_s26 = sand.u32 (!%p303_p9), 1, %s2802_s10  }
  0x13   : > { %v377_v24 = vld [vmem:[%s3702_s8] sm:$0xf] (!%p303_p9)  ;;  %s2390_s14 = sshll.u32 (!%p303_p9), %s340_s26, 5  ;;  %s3653_s13 = scalar_lea.sflag (!%p303_p9), [#allocation3], %s340_s26 }
  0x15   : > { %s3711_s25 = smov (!%p344_p10, %s2391_s25), 3 }
  0x16   : > { %s2392_s16 = sshll.u32 %s3711_s25, 3  ;;  %389 = vperm.xlu1 %2636, %v365_v13   ;;  %384 = vperm.xlu0 %2635, %v364_v14  }
  0x17   : > { %s347_s22 = scalar_lea.vmem %s3694_s0, %s2392_s16  ;;  %s2950_s27 = scalar_lea.vmem %s3695_s1, %s2392_s16 }
  0x18   : > { %v2957_v7 = vld [vmem:[%s347_s22 + $0x8] sm:$0xff]  ;;  %v2959_v8 = vld [vmem:[%s347_s22] sm:$0xff]  ;;  %s3284_s16 = scalar_lea.vmem [#allocation2], %s2390_s14 }
  0x19   : > { %v2962_v9 = vld [vmem:[%s2950_s27 + $0x8] sm:$0xff]  ;;  %2401 = vmatprep.subr.msk.mxu0 %vm415_vm0, %v2957_v7  ;;  %v635_v10 = vrot.slane %v2957_v7, 4  ;;  %v2970_v11 = vld [vmem:[%s2950_s27] sm:$0xff]  ;;  %v634_v12 = vrot.slane %v2959_v8, 4  ;;  %s2312_s28 = sshll.u32 %s3284_s16, 4  ;;  %s3640_s28 = int_to_ptr.vmem [resolvable:$true] %s2312_s28 }
  0x1a   : > { %2395 = vmatprep.subr.msk.mxu1 %vm415_vm0, %v2962_v9  ;;  %2402 = vmatpush1.msk.msra.mxu0 %vm415_vm0, %v2959_v8  ;;  %s2748_s21 = scalar_lea.vmem %s3640_s28, 512 }
  0x1b   : > { %2396 = vmatpush1.msk.msra.mxu1 %vm415_vm0, %v2970_v11  ;;  %2403 = vmatmul.mubr.msk.f32.vlgmr.msra.gmra.mrb[0].mxu0 %vm402_vm1, %v2920_v0  ;;  %p2749_p11 = scmp.ne.s32.totalorder %s3640_s28, %s2748_s21 }
  0x1c   : > { %2397 = vmatmul.mubr.msk.f32.vlgmr.msra.gmra.mrb[0].mxu1 %vm402_vm1, %v2955_v6  ;;  %599 = vmatprep.mubr.f32.mxu0 %v2813_v4 }
  0x1d   : > { %492 = vmatprep.mubr.f32.mxu1 %v2813_v4  ;;  %2407 = vmatprep.subr.msk.mxu0 %vm415_vm0, %v635_v10  ;;  %p2750_p12 = pnand %p2749_p11, %p2907_p5 }
  0x1e   : > { %2408 = vmatpush1.msk.msra.mxu0 %vm415_vm0, %v634_v12  ;;  %394 = vperm.xlu1 %2636, %v366_v16  }
  0x1f   : > { %2404 = vmatmul.mubr.msk.f32.gmra.mrb[2].mxu0 %vm402_vm1, %v2933_v2  ;;  %399 = vperm.xlu0 %2635, %v367_v17   ;;  %p2751_p13 = pneg %p2750_p12 }
  0x20   : > { %2398 = vmatmul.mubr.msk.f32.gmra.mrb[2].mxu1 %vm402_vm1, %v2992_v15  ;;  %605 = vmatprep.mubr.f32.mxu0 %v2813_v4 }
  0x21   : > { %498 = vmatprep.mubr.f32.mxu1 %v2813_v4 }
  0x22   : > { %819 = vperm.xlu1 %2636, %v372_v19  }
  0x23   : > { %2405 = vmatmul.mubr.msk.f32.gmra.mrb[4].mxu0 %vm402_vm1, %v2925_v1  ;;  %824 = vperm.xlu0 %2635, %v373_v20  }
  0x24   : > { %2399 = vmatmul.mubr.msk.f32.gmra.mrb[4].mxu1 %vm402_vm1, %v3015_v18  ;;  %611 = vmatprep.mubr.f32.mxu0 %v2813_v4 }
  0x25   : > { %504 = vmatprep.mubr.f32.mxu1 %v2813_v4 }
  0x26   : > { %829 = vperm.xlu1 %2636, %v374_v22  }
  0x27   : > { %2406 = vmatmul.mubr.msk.f32.gmra.mrb[6].mxu0 %vm402_vm1, %v2938_v3  ;;  %834 = vperm.xlu0 %2635, %v375_v23  }
  0x28   : > { %2400 = vmatmul.mubr.msk.f32.gmra.mrb[6].mxu1 %vm402_vm1, %v3032_v21  ;;  %712 = vmatprep.mubr.f32.mxu0 %v2813_v4 }
  0x29   : > { %914 = vmatprep.mubr.f32.mxu1 %v2813_v4 }
  0x2a   : > { %1013 = vperm.xlu1 %2636, %v377_v24  }
  0x80   : > { %v3049_v25 = vpop.permute.xlu0 %626  ;;  %v3056_v27 = vpop.permute.xlu1 %630 }
  0x81   : > { %2409 = vmatmul.mubr.msk.f32.vlgmr.msra.gmra.mrb[0].mxu0 %vm402_vm1, %v3049_v25 }
  0x82   : > { %718 = vmatprep.mubr.f32.mxu0 %v2813_v4 }
  0x84   : > { %v3054_v26 = vpop.permute.xlu0 %628  ;;  %v3063_v28 = vpop.permute.xlu1 %632 }
  0x85   : > { %2410 = vmatmul.mubr.msk.f32.gmra.mrb[2].mxu0 %vm402_vm1, %v3054_v26 }
  0x86   : > { %724 = vmatprep.mubr.f32.mxu0 %v2813_v4 }
  0x89   : > { %2411 = vmatmul.mubr.msk.f32.gmra.mrb[4].mxu0 %vm402_vm1, %v3056_v27 }
  0x8a   : > { %730 = vmatprep.mubr.f32.mxu0 %v2813_v4 }
  0x8d   : > { %2412 = vmatmul.mubr.msk.f32.gmra.mrb[6].mxu0 %vm402_vm1, %v3063_v28 }
  0x8e   : > { %1523 = vmatprep.mubr.f32.mxu0 %v2813_v4 }
  0x95   : > { %v3069_v37 = vpop.permute.xlu0 %384  ;;  %v3072_v39 = vpop.permute.xlu1 %389 }
  0x9d   : > { %v3083_v48 = vpop.permute.xlu1 %394 }
  0x9e   : > { %v3103_v16 = vpop.permute.xlu0 %399 }
  0xef   : > { %v488_v29 = vpop.f32.mrb[0].mxu1 }
  0xf0   : > { %v490_v30 = vpop.f32.mrb[1].mxu1  ;;  %v489_v38 = vadd.f32 %v488_v29, %v3069_v37 }
  0xf1   : > { %v491_v40 = vadd.f32 %v490_v30, %v3069_v37 }
  0xf3   : > { %v494_v31 = vpop.f32.mrb[2].mxu1 }
  0xf4   : > { %v496_v32 = vpop.f32.mrb[3].mxu1  ;;  %v495_v43 = vadd.f32 %v494_v31, %v3072_v39 }
  0xf5   : > { %v497_v46 = vadd.f32 %v496_v32, %v3072_v39 }
  0xf7   : > { %v500_v33 = vpop.f32.mrb[4].mxu1 }
  0xf8   : > { %v502_v34 = vpop.f32.mrb[5].mxu1  ;;  %v501_v52 = vadd.f32 %v500_v33, %v3083_v48 }
  0xf9   : > { %v503_v56 = vadd.f32 %v502_v34, %v3083_v48 }
  0xfb   : > { %v506_v35 = vpop.f32.mrb[6].mxu1 }
  0xfc   : > { %v508_v36 = vpop.f32.mrb[7].mxu1  ;;  %v507_v24 = vadd.f32 %v506_v35, %v3103_v16 }
  0xfd   : > { %v509_v32 = vadd.f32 %v508_v36, %v3103_v16 }
 0x154   : > { %v714_v41 = vpop.f32.mrb[0].mxu0 }
 0x155   : > { %v3075_v42 = vadd.f32 %v714_v41, %v489_v38  ;;  %v716_v44 = vpop.f32.mrb[1].mxu0 }
 0x156   : > { %v3078_v45 = vadd.f32 %v716_v44, %v491_v40 }
 0x157   : > { %v745_v47 = vmul.f32 %v3075_v42, %v3075_v42 }
 0x158   : > { %v746_v49 = vmul.f32 %v3078_v45, %v3078_v45  ;;  %v720_v50 = vpop.f32.mrb[2].mxu0 }
 0x159   : > { %v753_v51 = vmul.f32 %v3075_v42, %v745_v47  ;;  %v3089_v53 = vadd.f32 %v720_v50, %v495_v43  ;;  %v722_v54 = vpop.f32.mrb[3].mxu0 }
 0x15a   : > { %v754_v55 = vmul.f32 %v3078_v45, %v746_v49  ;;  %v3093_v57 = vadd.f32 %v722_v54, %v497_v46 }
 0x15b   : > { %v761_v58 = vmul.f32 0.044715, %v753_v51  ;;  %v747_v59 = vmul.f32 %v3089_v53, %v3089_v53 }
 0x15c   : > { %v762_v60 = vmul.f32 0.044715, %v754_v55  ;;  %v748_v61 = vmul.f32 %v3093_v57, %v3093_v57  ;;  %v726_v62 = vpop.f32.mrb[4].mxu0 }
 0x15d   : > { %v769_v63 = vadd.f32 %v3075_v42, %v761_v58  ;;  %v755_v5 = vmul.f32 %v3089_v53, %v747_v59  ;;  %v3101_v13 = vadd.f32 %v726_v62, %v501_v52  ;;  %v728_v14 = vpop.f32.mrb[5].mxu0 }
 0x15e   : > { %v770_v17 = vadd.f32 %v3078_v45, %v762_v60  ;;  %v756_v19 = vmul.f32 %v3093_v57, %v748_v61  ;;  %v3107_v20 = vadd.f32 %v728_v14, %v503_v56 }
 0x15f   : > { %v777_v22 = vmul.f32 0.7978846, %v769_v63  ;;  %v763_v23 = vmul.f32 0.044715, %v755_v5  ;;  %v749_v29 = vmul.f32 %v3101_v13, %v3101_v13 }
 0x160   : > { %v778_v30 = vmul.f32 0.7978846, %v770_v17  ;;  %v764_v31 = vmul.f32 0.044715, %v756_v19  ;;  %v750_v33 = vmul.f32 %v3107_v20, %v3107_v20  ;;  %v732_v34 = vpop.f32.mrb[6].mxu0 }
 0x161   : > { %2637 = vtanh.f32 %v777_v22  ;;  %v771_v38 = vadd.f32 %v3089_v53, %v763_v23  ;;  %v757_v40 = vmul.f32 %v3101_v13, %v749_v29  ;;  %v3117_v41 = vadd.f32 %v732_v34, %v507_v24  ;;  %v734_v43 = vpop.f32.mrb[7].mxu0 }
 0x162   : > { %2639 = vtanh.f32 %v778_v30  ;;  %v772_v35 = vadd.f32 %v3093_v57, %v764_v31  ;;  %v758_v44 = vmul.f32 %v3107_v20, %v750_v33  ;;  %v2533_v46 = vadd.f32 %v734_v43, %v509_v32 }
 0x163   : > { %v779_v47 = vmul.f32 0.7978846, %v771_v38  ;;  %v765_v36 = vmul.f32 0.044715, %v757_v40  ;;  %v751_v49 = vmul.f32 %v3117_v41, %v3117_v41 }
 0x164   : > { %v780_v50 = vmul.f32 0.7978846, %v772_v35  ;;  %v766_v51 = vmul.f32 0.044715, %v758_v44  ;;  %v752_v52 = vmul.f32 %v2533_v46, %v2533_v46 }
 0x165   : > { %2641 = vtanh.f32 %v779_v47  ;;  %v773_v54 = vadd.f32 %v3101_v13, %v765_v36  ;;  %v759_v55 = vmul.f32 %v3117_v41, %v751_v49 }
 0x166   : > { %2643 = vtanh.f32 %v780_v50  ;;  %v774_v56 = vadd.f32 %v3107_v20, %v766_v51  ;;  %v760_v58 = vmul.f32 %v2533_v46, %v752_v52 }
 0x167   : > { %v781_v59 = vmul.f32 0.7978846, %v773_v54  ;;  %v767_v60 = vmul.f32 0.044715, %v759_v55 }
 0x168   : > { %v782_v61 = vmul.f32 0.7978846, %v774_v56  ;;  %v768_v62 = vmul.f32 0.044715, %v760_v58 }
 0x169   : > { %2645 = vtanh.f32 %v781_v59  ;;  %v775_v63 = vadd.f32 %v3117_v41, %v767_v60 }
 0x16a   : > { %2647 = vtanh.f32 %v782_v61  ;;  %v776_v5 = vadd.f32 %v2533_v46, %v768_v62 }
 0x16b   : > { %v2638_v14 = vpop.eup %2637  ;;  %v783_v17 = vmul.f32 0.7978846, %v775_v63 }
 0x16c   : > { %v2640_v19 = vpop.eup %2639  ;;  %v793_v22 = vadd.f32 1.0, %v2638_v14  ;;  %v784_v23 = vmul.f32 0.7978846, %v776_v5 }
 0x16d   : > { %2649 = vtanh.f32 %v783_v17  ;;  %v794_v24 = vadd.f32 1.0, %v2640_v19  ;;  %v3137_v17 = vld [vmem:[%s3699_s5] sm:$0xff] }
 0x16e   : > { %2651 = vtanh.f32 %v784_v23  ;;  %v801_v31 = vmul.f32 0.5, %v793_v22 }
 0x16f   : > { %v2642_v29 = vpop.eup %2641  ;;  %v802_v34 = vmul.f32 0.5, %v794_v24 }
 0x170   : > { %v2644_v30 = vpop.eup %2643  ;;  %v795_v32 = vadd.f32 1.0, %v2642_v29  ;;  %v809_v44 = vmul.f32 %v3075_v42, %v801_v31 }
 0x171   : > { %v796_v33 = vadd.f32 1.0, %v2644_v30  ;;  %v810_v49 = vmul.f32 %v3078_v45, %v802_v34  ;;  %v3176_v30 = vpop.permute.xlu0 %824 }
 0x172   : > { %v803_v38 = vmul.f32 0.5, %v795_v32 }
 0x173   : > { %v2646_v40 = vpop.eup %2645  ;;  %v804_v43 = vmul.f32 0.5, %v796_v33 }
 0x174   : > { %v2648_v35 = vpop.eup %2647  ;;  %v811_v47 = vmul.f32 %v3089_v53, %v803_v38  ;;  %v797_v36 = vadd.f32 1.0, %v2646_v40 }
 0x175   : > { %v812_v50 = vmul.f32 %v3093_v57, %v804_v43  ;;  %v798_v51 = vadd.f32 1.0, %v2648_v35 }
 0x176   : > { %v2472_v52 = vpack.c.bf16 %v811_v47, %v809_v44  ;;  %v805_v58 = vmul.f32 0.5, %v797_v36 }
 0x177   : > { %v2650_v54 = vpop.eup %2649  ;;  %v2470_v55 = vpack.c.bf16 %v812_v50, %v810_v49  ;;  %v806_v61 = vmul.f32 0.5, %v798_v51 }
 0x178   : > { %v2652_v56 = vpop.eup %2651  ;;  %v799_v59 = vadd.f32 1.0, %v2650_v54  ;;  %v813_v53 = vmul.f32 %v3101_v13, %v805_v58  ;;  %v3145_v13 = vld [vmem:[%s3699_s5 + $0x8] sm:$0xff] }
 0x179   : > { %2471 = vmatprep.subr.bf16.mxu1 %v2470_v55  ;;  %v800_v60 = vadd.f32 1.0, %v2652_v56  ;;  %v814_v45 = vmul.f32 %v3107_v20, %v806_v61  ;;  %v3153_v20 = vld [vmem:[%s3699_s5 + $0x10] sm:$0xff] }
 0x17a   : > { %v807_v62 = vmul.f32 0.5, %v799_v59  ;;  %2473 = vmatpush1.bf16.msra.mxu1 %v2472_v52 }
 0x17b   : > { %v808_v42 = vmul.f32 0.5, %v800_v60 }
 0x17c   : > { %v815_v63 = vmul.f32 %v3117_v41, %v807_v62  ;;  %v3161_v41 = vld [vmem:[%s3699_s5 + $0x18] sm:$0xff] }
 0x17d   : > { %v816_v57 = vmul.f32 %v2533_v46, %v808_v42  ;;  %v3166_v46 = vpop.permute.xlu1 %819  ;;  %v3206_v42 = vpop.permute.xlu0 %834 }
 0x17e   : > { %v2476_v5 = vpack.c.bf16 %v815_v63, %v813_v53 }
 0x17f   : > { %v2474_v14 = vpack.c.bf16 %v816_v57, %v814_v45 }
 0x181   : > { %2475 = vmatprep.subr.bf16.mxu1 %v2474_v14  ;;  %v3190_v47 = vpop.permute.xlu1 %829 }
 0x182   : > { %2477 = vmatpush1.bf16.msra.mxu1 %v2476_v5 }
 0x185   : > { %2413 = vmatmul.mubr.msk.f32.vlgmr.msra.gmra.mrb[8].mxu1 %vm837_vm2, %v3137_v17 }
 0x186   : > { %920 = vmatprep.mubr.f32.mxu1 %v2813_v4 }
 0x189   : > { %2414 = vmatmul.mubr.msk.f32.gmra.mrb[10].mxu1 %vm837_vm2, %v3145_v13 }
 0x18a   : > { %926 = vmatprep.mubr.f32.mxu1 %v2813_v4 }
 0x18d   : > { %2415 = vmatmul.mubr.msk.f32.gmra.mrb[12].mxu1 %vm837_vm2, %v3153_v20 }
 0x18e   : > { %932 = vmatprep.mubr.f32.mxu1 %v2813_v4 }
 0x191   : > { %2416 = vmatmul.mubr.msk.f32.gmra.mrb[14].mxu1 %vm837_vm2, %v3161_v41 }
 0x192   : > { %1083 = vmatprep.mubr.f32.mxu1 %v2813_v4 }
 0x258   : > { %v916_v19 = vpop.f32.mrb[8].mxu1 }
 0x259   : > { %v3169_v22 = vadd.f32 %v916_v19, %v3166_v46  ;;  %v918_v23 = vpop.f32.mrb[9].mxu1 }
 0x25a   : > { %v3172_v24 = vadd.f32 %v918_v23, %v3166_v46 }
 0x25b   : > { %v939_v29 = vmul.f32 %v3169_v22, %v3169_v22 }
 0x25c   : > { %v940_v31 = vmul.f32 %v3172_v24, %v3172_v24  ;;  %v922_v32 = vpop.f32.mrb[10].mxu1 }
 0x25d   : > { %v947_v33 = vmul.f32 %v939_v29, %v3169_v22  ;;  %v3182_v34 = vadd.f32 %v922_v32, %v3176_v30  ;;  %v924_v38 = vpop.f32.mrb[11].mxu1 }
 0x25e   : > { %v948_v40 = vmul.f32 %v940_v31, %v3172_v24  ;;  %v3186_v43 = vadd.f32 %v924_v38, %v3176_v30 }
 0x25f   : > { %v955_v35 = vmul.f32 0.044715, %v947_v33  ;;  %v941_v44 = vmul.f32 %v3182_v34, %v3182_v34 }
 0x260   : > { %v956_v36 = vmul.f32 0.044715, %v948_v40  ;;  %v942_v49 = vmul.f32 %v3186_v43, %v3186_v43  ;;  %v928_v50 = vpop.f32.mrb[12].mxu1 }
 0x261   : > { %v963_v51 = vadd.f32 %v955_v35, %v3169_v22  ;;  %v949_v52 = vmul.f32 %v941_v44, %v3182_v34  ;;  %v3197_v54 = vadd.f32 %v928_v50, %v3190_v47  ;;  %v930_v55 = vpop.f32.mrb[13].mxu1 }
 0x262   : > { %v964_v56 = vadd.f32 %v956_v36, %v3172_v24  ;;  %v950_v58 = vmul.f32 %v942_v49, %v3186_v43  ;;  %v3202_v59 = vadd.f32 %v930_v55, %v3190_v47 }
 0x263   : > { %v971_v60 = vmul.f32 0.7978846, %v963_v51  ;;  %v957_v61 = vmul.f32 0.044715, %v949_v52  ;;  %v943_v62 = vmul.f32 %v3197_v54, %v3197_v54 }
 0x264   : > { %v972_v53 = vmul.f32 0.7978846, %v964_v56  ;;  %v958_v63 = vmul.f32 0.044715, %v950_v58  ;;  %v944_v45 = vmul.f32 %v3202_v59, %v3202_v59  ;;  %v934_v57 = vpop.f32.mrb[14].mxu1 }
 0x265   : > { %2653 = vtanh.f32 %v971_v60  ;;  %v965_v5 = vadd.f32 %v957_v61, %v3182_v34  ;;  %v951_v14 = vmul.f32 %v943_v62, %v3197_v54  ;;  %v3213_v19 = vadd.f32 %v934_v57, %v3206_v42  ;;  %v936_v23 = vpop.f32.mrb[15].mxu1 }
 0x266   : > { %2655 = vtanh.f32 %v972_v53  ;;  %v966_v29 = vadd.f32 %v958_v63, %v3186_v43  ;;  %v952_v31 = vmul.f32 %v944_v45, %v3202_v59  ;;  %v937_v32 = vadd.f32 %v936_v23, %v3206_v42 }
 0x267   : > { %v973_v33 = vmul.f32 0.7978846, %v965_v5  ;;  %v959_v38 = vmul.f32 0.044715, %v951_v14  ;;  %v945_v40 = vmul.f32 %v3213_v19, %v3213_v19 }
 0x268   : > { %v974_v35 = vmul.f32 0.7978846, %v966_v29  ;;  %v960_v44 = vmul.f32 0.044715, %v952_v31  ;;  %v946_v36 = vmul.f32 %v937_v32, %v937_v32 }
 0x269   : > { %2657 = vtanh.f32 %v973_v33  ;;  %v967_v49 = vadd.f32 %v959_v38, %v3197_v54  ;;  %v953_v50 = vmul.f32 %v945_v40, %v3213_v19 }
 0x26a   : > { %2659 = vtanh.f32 %v974_v35  ;;  %v968_v51 = vadd.f32 %v960_v44, %v3202_v59  ;;  %v954_v52 = vmul.f32 %v946_v36, %v937_v32 }
 0x26b   : > { %v975_v55 = vmul.f32 0.7978846, %v967_v49  ;;  %v961_v56 = vmul.f32 0.044715, %v953_v50 }
 0x26c   : > { %v976_v58 = vmul.f32 0.7978846, %v968_v51  ;;  %v962_v60 = vmul.f32 0.044715, %v954_v52 }
 0x26d   : > { %2661 = vtanh.f32 %v975_v55  ;;  %v969_v61 = vadd.f32 %v961_v56, %v3213_v19 }
 0x26e   : > { %2663 = vtanh.f32 %v976_v58  ;;  %v970_v62 = vadd.f32 %v962_v60, %v937_v32 }
 0x26f   : > { %v2654_v53 = vpop.eup %2653  ;;  %v977_v63 = vmul.f32 0.7978846, %v969_v61 }
 0x270   : > { %v2656_v45 = vpop.eup %2655  ;;  %v987_v57 = vadd.f32 1.0, %v2654_v53  ;;  %v978_v5 = vmul.f32 0.7978846, %v970_v62 }
 0x271   : > { %2665 = vtanh.f32 %v977_v63  ;;  %v988_v14 = vadd.f32 1.0, %v2656_v45 }
 0x272   : > { %2667 = vtanh.f32 %v978_v5  ;;  %v995_v31 = vmul.f32 0.5, %v987_v57 }
 0x273   : > { %v2658_v23 = vpop.eup %2657  ;;  %v996_v40 = vmul.f32 0.5, %v988_v14 }
 0x274   : > { %v2660_v29 = vpop.eup %2659  ;;  %v989_v33 = vadd.f32 1.0, %v2658_v23  ;;  %v1003_v50 = vmul.f32 %v995_v31, %v3169_v22  ;;  %v1093_v31 = vrot.slane %v2962_v9, 2 }
 0x275   : > { %v990_v38 = vadd.f32 1.0, %v2660_v29  ;;  %v1004_v55 = vmul.f32 %v996_v40, %v3172_v24  ;;  %v3236_v40 = vld [vmem:[%s3701_s7] sm:$0xf] }
 0x276   : > { %v997_v35 = vmul.f32 0.5, %v989_v33 }
 0x277   : > { %v2662_v44 = vpop.eup %2661  ;;  %v998_v36 = vmul.f32 0.5, %v990_v38  ;;  %v1092_v38 = vrot.slane %v2970_v11, 2 }
 0x278   : > { %v2664_v49 = vpop.eup %2663  ;;  %v1005_v51 = vmul.f32 %v997_v35, %v3182_v34  ;;  %v991_v52 = vadd.f32 1.0, %v2662_v44 }
 0x279   : > { %v1006_v56 = vmul.f32 %v998_v36, %v3186_v43  ;;  %v992_v58 = vadd.f32 1.0, %v2664_v49 }
 0x27a   : > { %v2480_v60 = vpack.c.bf16 %v1005_v51, %v1003_v50  ;;  %v999_v63 = vmul.f32 0.5, %v991_v52 }
 0x27b   : > { %v2666_v61 = vpop.eup %2665  ;;  %v2478_v62 = vpack.c.bf16 %v1006_v56, %v1004_v55  ;;  %v1000_v5 = vmul.f32 0.5, %v992_v58 }
 0x27c   : > { %v2668_v53 = vpop.eup %2667  ;;  %v993_v45 = vadd.f32 1.0, %v2666_v61  ;;  %v1007_v34 = vmul.f32 %v999_v63, %v3197_v54 }
 0x27d   : > { %2479 = vmatprep.subr.bf16.mxu1 %v2478_v62  ;;  %v994_v57 = vadd.f32 1.0, %v2668_v53  ;;  %v1008_v24 = vmul.f32 %v1000_v5, %v3202_v59 }
 0x27e   : > { %v1001_v14 = vmul.f32 0.5, %v993_v45  ;;  %2481 = vmatpush1.bf16.msra.mxu1 %v2480_v60 }
 0x27f   : > { %v1002_v22 = vmul.f32 0.5, %v994_v57 }
 0x280   : > { %v1009_v23 = vmul.f32 %v1001_v14, %v3213_v19 }
 0x281   : > { %v1010_v43 = vmul.f32 %v1002_v22, %v937_v32 }
 0x282   : > { %v2484_v29 = vpack.c.bf16 %v1009_v23, %v1007_v34 }
 0x283   : > { %v2482_v33 = vpack.c.bf16 %v1010_v43, %v1008_v24 }
 0x285   : > { %2483 = vmatprep.subr.bf16.mxu1 %v2482_v33 }
 0x286   : > { %2485 = vmatpush1.bf16.msra.mxu1 %v2484_v29 }
 0x287   : > { %2418 = vmatprep.subr.msk.mxu1 %vm415_vm0, %v1093_v31 }
 0x289   : > { %2417 = vmatmul.mubr.msk.f32.vlgmr.msra.gmra.mrb[16].mxu1 %vm837_vm2, %v3236_v40 }
 0x28a   : > { %2419 = vmatpush1.msk.msra.mxu1 %vm415_vm0, %v1092_v38  ;;  %1162 = vmatprep.mubr.f32.mxu1 %v2813_v4 }
 0x28b   : > { %2424 = vmatprep.subr.msk.mxu1 %vm415_vm0, %v635_v10 }
 0x28d   : > { %2420 = vmatmul.mubr.msk.f32.vlgmr.msra.gmra.mrb[18].mxu1 %vm402_vm1, %v2955_v6 }
 0x28e   : > { %1168 = vmatprep.mubr.f32.mxu1 %v2813_v4  ;;  %2425 = vmatpush1.msk.msra.mxu1 %vm415_vm0, %v634_v12 }
 0x291   : > { %2421 = vmatmul.mubr.msk.f32.gmra.mrb[20].mxu1 %vm402_vm1, %v2992_v15 }
 0x292   : > { %1174 = vmatprep.mubr.f32.mxu1 %v2813_v4 }
 0x295   : > { %2422 = vmatmul.mubr.msk.f32.gmra.mrb[22].mxu1 %vm402_vm1, %v3015_v18 }
 0x296   : > { %1180 = vmatprep.mubr.f32.mxu1 %v2813_v4 }
 0x299   : > { %2423 = vmatmul.mubr.msk.f32.gmra.mrb[24].mxu1 %vm402_vm1, %v3032_v21 }
 0x29a   : > { %1251 = vmatprep.mubr.f32.mxu1 %v2813_v4 }
 0x29d   : > { %2426 = vmatmul.mubr.msk.f32.vlgmr.msra.gmra.mrb[18].mxu1 %vm402_vm1, %v2920_v0  ;;  %v3276_v0 = vpop.permute.xlu1 %1013 }
 0x29e   : > { %1257 = vmatprep.mubr.f32.mxu1 %v2813_v4 }
 0x2a1   : > { %2427 = vmatmul.mubr.msk.f32.gmra.mrb[20].mxu1 %vm402_vm1, %v2933_v2 }
 0x2a2   : > { %1263 = vmatprep.mubr.f32.mxu1 %v2813_v4 }
 0x2a5   : > { %2428 = vmatmul.mubr.msk.f32.gmra.mrb[22].mxu1 %vm402_vm1, %v2925_v1 }
 0x2a6   : > { %1269 = vmatprep.mubr.f32.mxu1 %v2813_v4 }
 0x2a9   : > { %2429 = vmatmul.mubr.msk.f32.gmra.mrb[24].mxu1 %vm402_vm1, %v2938_v3 }
 0x2aa   : > { %1354 = vmatprep.mubr.f32.mxu1 %v2813_v4 }
 0x35c   : > { %v1085_v6 = vpop.f32.mrb[16].mxu1 }
 0x35d   : > { %v3279_v2 = vadd.f32 %v1085_v6, %v3276_v0  ;;  %v1087_v7 = vpop.f32.mrb[17].mxu1 }
 0x35e   : > { %v3282_v8 = vadd.f32 %v1087_v7, %v3276_v0 }
 0x35f   : > { %1090 = vst [vmem:[%s3284_s16] sm:$0xf] %v3279_v2 }
 0x360   : > { %1091 = vst [vmem:[%s3284_s16 + $0x8] sm:$0xf] %v3282_v8  ;;  %2430 = vmatprep.subr.msk.mxu1 %vm415_vm0, %v3282_v8 }
 0x361   : > { %2431 = vmatpush1.msk.msra.mxu1 %vm415_vm0, %v3279_v2 }
 0x362   : > { %2432 = vmatmul.mubr.msk.f32.vlgmr.msra.gmra.mrb[18].mxu1 %vm402_vm1, %v3049_v25 }
 0x363   : > { %1360 = vmatprep.mubr.f32.mxu1 %v2813_v4 }
 0x366   : > { %2433 = vmatmul.mubr.msk.f32.gmra.mrb[20].mxu1 %vm402_vm1, %v3054_v26 }
 0x367   : > { %1366 = vmatprep.mubr.f32.mxu1 %v2813_v4 }
 0x36a   : > { %2434 = vmatmul.mubr.msk.f32.gmra.mrb[22].mxu1 %vm402_vm1, %v3056_v27 }
 0x36b   : > { %1372 = vmatprep.mubr.f32.mxu1 %v2813_v4 }
 0x36e   : > { %2435 = vmatmul.mubr.msk.f32.gmra.mrb[24].mxu1 %vm402_vm1, %v3063_v28 }
 0x36f   : > { %2128 = vmatprep.mubr.f32.mxu1 %v2813_v4 }
 0x435   : > { %v1356_v1 = vpop.f32.mrb[18].mxu1 }
 0x436   : > { %v3307_v3 = vadd.f32 %v1356_v1, %v3069_v37  ;;  %v1358_v9 = vpop.f32.mrb[19].mxu1 }
 0x437   : > { %v3310_v10 = vadd.f32 %v1358_v9, %v3069_v37 }
 0x438   : > { %v1387_v11 = vmul.f32 %v3307_v3, %v3307_v3 }
 0x439   : > { %v1388_v12 = vmul.f32 %v3310_v10, %v3310_v10  ;;  %v1362_v15 = vpop.f32.mrb[20].mxu1 }
 0x43a   : > { %v1395_v18 = vmul.f32 %v3307_v3, %v1387_v11  ;;  %v3318_v21 = vadd.f32 %v1362_v15, %v3072_v39  ;;  %v1364_v54 = vpop.f32.mrb[21].mxu1 }
 0x43b   : > { %v1396_v59 = vmul.f32 %v3310_v10, %v1388_v12  ;;  %v3322_v19 = vadd.f32 %v1364_v54, %v3072_v39 }
 0x43c   : > { %v1403_v32 = vmul.f32 0.044715, %v1395_v18  ;;  %v1389_v35 = vmul.f32 %v3318_v21, %v3318_v21 }
 0x43d   : > { %v1404_v44 = vmul.f32 0.044715, %v1396_v59  ;;  %v1390_v36 = vmul.f32 %v3322_v19, %v3322_v19  ;;  %v1368_v49 = vpop.f32.mrb[22].mxu1 }
 0x43e   : > { %v1411_v50 = vadd.f32 %v3307_v3, %v1403_v32  ;;  %v1397_v51 = vmul.f32 %v3318_v21, %v1389_v35  ;;  %v3331_v52 = vadd.f32 %v1368_v49, %v3083_v48  ;;  %v1370_v55 = vpop.f32.mrb[23].mxu1 }
 0x43f   : > { %v1412_v56 = vadd.f32 %v3310_v10, %v1404_v44  ;;  %v1398_v58 = vmul.f32 %v3322_v19, %v1390_v36  ;;  %v3336_v60 = vadd.f32 %v1370_v55, %v3083_v48 }
 0x440   : > { %v1419_v61 = vmul.f32 0.7978846, %v1411_v50  ;;  %v1405_v62 = vmul.f32 0.044715, %v1397_v51  ;;  %v1391_v53 = vmul.f32 %v3331_v52, %v3331_v52 }
 0x441   : > { %v1420_v63 = vmul.f32 0.7978846, %v1412_v56  ;;  %v1406_v45 = vmul.f32 0.044715, %v1398_v58  ;;  %v1392_v57 = vmul.f32 %v3336_v60, %v3336_v60  ;;  %v1374_v5 = vpop.f32.mrb[24].mxu1 }
 0x442   : > { %2669 = vtanh.f32 %v1419_v61  ;;  %v1413_v14 = vadd.f32 %v3318_v21, %v1405_v62  ;;  %v1399_v22 = vmul.f32 %v3331_v52, %v1391_v53  ;;  %v3345_v34 = vadd.f32 %v1374_v5, %v3103_v16  ;;  %v1376_v23 = vpop.f32.mrb[25].mxu1 }
 0x443   : > { %2671 = vtanh.f32 %v1420_v63  ;;  %v1414_v24 = vadd.f32 %v3322_v19, %v1406_v45  ;;  %v1400_v43 = vmul.f32 %v3336_v60, %v1392_v57  ;;  %v2541_v29 = vadd.f32 %v1376_v23, %v3103_v16 }
 0x444   : > { %v1421_v31 = vmul.f32 0.7978846, %v1413_v14  ;;  %v1407_v33 = vmul.f32 0.044715, %v1399_v22  ;;  %v1393_v38 = vmul.f32 %v3345_v34, %v3345_v34 }
 0x445   : > { %v1422_v6 = vmul.f32 0.7978846, %v1414_v24  ;;  %v1408_v7 = vmul.f32 0.044715, %v1400_v43  ;;  %v1394_v1 = vmul.f32 %v2541_v29, %v2541_v29 }
 0x446   : > { %2673 = vtanh.f32 %v1421_v31  ;;  %v1415_v9 = vadd.f32 %v3331_v52, %v1407_v33  ;;  %v1401_v11 = vmul.f32 %v3345_v34, %v1393_v38 }
 0x447   : > { %2675 = vtanh.f32 %v1422_v6  ;;  %v1416_v12 = vadd.f32 %v3336_v60, %v1408_v7  ;;  %v1402_v15 = vmul.f32 %v2541_v29, %v1394_v1 }
 0x448   : > { %v1423_v18 = vmul.f32 0.7978846, %v1415_v9  ;;  %v1409_v54 = vmul.f32 0.044715, %v1401_v11 }
 0x449   : > { %v1424_v59 = vmul.f32 0.7978846, %v1416_v12  ;;  %v1410_v32 = vmul.f32 0.044715, %v1402_v15 }
 0x44a   : > { %2677 = vtanh.f32 %v1423_v18  ;;  %v1417_v35 = vadd.f32 %v3345_v34, %v1409_v54 }
 0x44b   : > { %2679 = vtanh.f32 %v1424_v59  ;;  %v1418_v44 = vadd.f32 %v2541_v29, %v1410_v32 }
 0x44c   : > { %v2670_v36 = vpop.eup %2669  ;;  %v1425_v49 = vmul.f32 0.7978846, %v1417_v35 }
 0x44d   : > { %v2672_v50 = vpop.eup %2671  ;;  %v1435_v51 = vadd.f32 1.0, %v2670_v36  ;;  %v1426_v55 = vmul.f32 0.7978846, %v1418_v44 }
 0x44e   : > { %2681 = vtanh.f32 %v1425_v49  ;;  %v1436_v56 = vadd.f32 1.0, %v2672_v50 }
 0x44f   : > { %2683 = vtanh.f32 %v1426_v55  ;;  %v1443_v62 = vmul.f32 0.5, %v1435_v51 }
 0x450   : > { %v2674_v58 = vpop.eup %2673  ;;  %v1444_v45 = vmul.f32 0.5, %v1436_v56 }
 0x451   : > { %v2676_v61 = vpop.eup %2675  ;;  %v1437_v53 = vadd.f32 1.0, %v2674_v58  ;;  %v1451_v23 = vmul.f32 %v3307_v3, %v1443_v62 }
 0x452   : > { %v1438_v63 = vadd.f32 1.0, %v2676_v61  ;;  %v1452_v31 = vmul.f32 %v3310_v10, %v1444_v45 }
 0x453   : > { %v1445_v57 = vmul.f32 0.5, %v1437_v53 }
 0x454   : > { %v2678_v5 = vpop.eup %2677  ;;  %v1446_v14 = vmul.f32 0.5, %v1438_v63 }
 0x455   : > { %v2680_v22 = vpop.eup %2679  ;;  %v1453_v24 = vmul.f32 %v3318_v21, %v1445_v57  ;;  %v1439_v43 = vadd.f32 1.0, %v2678_v5 }
 0x456   : > { %v1454_v33 = vmul.f32 %v3322_v19, %v1446_v14  ;;  %v1440_v38 = vadd.f32 1.0, %v2680_v22 }
 0x457   : > { %v2488_v6 = vpack.c.bf16 %v1453_v24, %v1451_v23  ;;  %v1447_v11 = vmul.f32 0.5, %v1439_v43 }
 0x458   : > { %v2682_v7 = vpop.eup %2681  ;;  %v2486_v1 = vpack.c.bf16 %v1454_v33, %v1452_v31  ;;  %v1448_v18 = vmul.f32 0.5, %v1440_v38 }
 0x459   : > { %v2684_v9 = vpop.eup %2683  ;;  %v1441_v12 = vadd.f32 1.0, %v2682_v7  ;;  %v1455_v21 = vmul.f32 %v3331_v52, %v1447_v11 }
 0x45a   : > { %2487 = vmatprep.subr.bf16.mxu0 %v2486_v1  ;;  %v1442_v15 = vadd.f32 1.0, %v2684_v9  ;;  %v1456_v10 = vmul.f32 %v3336_v60, %v1448_v18 }
 0x45b   : > { %v1449_v54 = vmul.f32 0.5, %v1441_v12  ;;  %2489 = vmatpush1.bf16.msra.mxu0 %v2488_v6 }
 0x45c   : > { %v1450_v3 = vmul.f32 0.5, %v1442_v15 }
 0x45d   : > { %v1457_v59 = vmul.f32 %v3345_v34, %v1449_v54 }
 0x45e   : > { %v1458_v19 = vmul.f32 %v2541_v29, %v1450_v3 }
 0x45f   : > { %v2492_v32 = vpack.c.bf16 %v1457_v59, %v1455_v21 }
 0x460   : > { %v2490_v35 = vpack.c.bf16 %v1458_v19, %v1456_v10 }
 0x462   : > { %2491 = vmatprep.subr.bf16.mxu0 %v2490_v35 }
 0x463   : > { %2493 = vmatpush1.bf16.msra.mxu0 %v2492_v32 }
 0x466   : > { %2436 = vmatmul.mubr.msk.f32.vlgmr.msra.gmra.mrb[8].mxu0 %vm837_vm2, %v3137_v17 }
 0x467   : > { %1529 = vmatprep.mubr.f32.mxu0 %v2813_v4 }
 0x46a   : > { %2437 = vmatmul.mubr.msk.f32.gmra.mrb[10].mxu0 %vm837_vm2, %v3145_v13 }
 0x46b   : > { %1535 = vmatprep.mubr.f32.mxu0 %v2813_v4 }
 0x46e   : > { %2438 = vmatmul.mubr.msk.f32.gmra.mrb[12].mxu0 %vm837_vm2, %v3153_v20 }
 0x46f   : > { %1541 = vmatprep.mubr.f32.mxu0 %v2813_v4 }
 0x472   : > { %2439 = vmatmul.mubr.msk.f32.gmra.mrb[14].mxu0 %vm837_vm2, %v3161_v41 }
 0x473   : > { %1684 = vmatprep.mubr.f32.mxu0 %v2813_v4 }
 0x539   : > { %v1525_v52 = vpop.f32.mrb[8].mxu0 }
 0x53a   : > { %v3376_v17 = vadd.f32 %v1525_v52, %v3166_v46  ;;  %v1527_v60 = vpop.f32.mrb[9].mxu0 }
 0x53b   : > { %v3379_v34 = vadd.f32 %v1527_v60, %v3166_v46 }
 0x53c   : > { %v1548_v13 = vmul.f32 %v3376_v17, %v3376_v17 }
 0x53d   : > { %v1549_v20 = vmul.f32 %v3379_v34, %v3379_v34  ;;  %v1531_v29 = vpop.f32.mrb[10].mxu0 }
 0x53e   : > { %v1556_v44 = vmul.f32 %v1548_v13, %v3376_v17  ;;  %v3387_v41 = vadd.f32 %v1531_v29, %v3176_v30  ;;  %v1533_v36 = vpop.f32.mrb[11].mxu0 }
 0x53f   : > { %v1557_v49 = vmul.f32 %v1549_v20, %v3379_v34  ;;  %v3391_v50 = vadd.f32 %v1533_v36, %v3176_v30 }
 0x540   : > { %v1564_v51 = vmul.f32 0.044715, %v1556_v44  ;;  %v1550_v55 = vmul.f32 %v3387_v41, %v3387_v41 }
 0x541   : > { %v1565_v56 = vmul.f32 0.044715, %v1557_v49  ;;  %v1551_v58 = vmul.f32 %v3391_v50, %v3391_v50  ;;  %v1537_v61 = vpop.f32.mrb[12].mxu0 }
 0x542   : > { %v1572_v62 = vadd.f32 %v1564_v51, %v3376_v17  ;;  %v1558_v53 = vmul.f32 %v1550_v55, %v3387_v41  ;;  %v3400_v63 = vadd.f32 %v1537_v61, %v3190_v47  ;;  %v1539_v45 = vpop.f32.mrb[13].mxu0 }
 0x543   : > { %v1573_v57 = vadd.f32 %v1565_v56, %v3379_v34  ;;  %v1559_v5 = vmul.f32 %v1551_v58, %v3391_v50  ;;  %v3405_v14 = vadd.f32 %v1539_v45, %v3190_v47 }
 0x544   : > { %v1580_v22 = vmul.f32 0.7978846, %v1572_v62  ;;  %v1566_v23 = vmul.f32 0.044715, %v1558_v53  ;;  %v1552_v24 = vmul.f32 %v3400_v63, %v3400_v63 }
 0x545   : > { %v1581_v43 = vmul.f32 0.7978846, %v1573_v57  ;;  %v1567_v31 = vmul.f32 0.044715, %v1559_v5  ;;  %v1553_v33 = vmul.f32 %v3405_v14, %v3405_v14  ;;  %v1543_v38 = vpop.f32.mrb[14].mxu0 }
 0x546   : > { %2685 = vtanh.f32 %v1580_v22  ;;  %v1574_v6 = vadd.f32 %v1566_v23, %v3387_v41  ;;  %v1560_v7 = vmul.f32 %v1552_v24, %v3400_v63  ;;  %v3414_v1 = vadd.f32 %v1543_v38, %v3206_v42  ;;  %v1545_v9 = vpop.f32.mrb[15].mxu0 }
 0x547   : > { %2687 = vtanh.f32 %v1581_v43  ;;  %v1575_v11 = vadd.f32 %v1567_v31, %v3391_v50  ;;  %v1561_v12 = vmul.f32 %v1553_v33, %v3405_v14  ;;  %v1546_v15 = vadd.f32 %v1545_v9, %v3206_v42 }
 0x548   : > { %v1582_v18 = vmul.f32 0.7978846, %v1574_v6  ;;  %v1568_v54 = vmul.f32 0.044715, %v1560_v7  ;;  %v1554_v3 = vmul.f32 %v3414_v1, %v3414_v1 }
 0x549   : > { %v1583_v21 = vmul.f32 0.7978846, %v1575_v11  ;;  %v1569_v59 = vmul.f32 0.044715, %v1561_v12  ;;  %v1555_v10 = vmul.f32 %v1546_v15, %v1546_v15 }
 0x54a   : > { %2689 = vtanh.f32 %v1582_v18  ;;  %v1576_v19 = vadd.f32 %v1568_v54, %v3400_v63  ;;  %v1562_v32 = vmul.f32 %v1554_v3, %v3414_v1 }
 0x54b   : > { %2691 = vtanh.f32 %v1583_v21  ;;  %v1577_v35 = vadd.f32 %v1569_v59, %v3405_v14  ;;  %v1563_v52 = vmul.f32 %v1555_v10, %v1546_v15 }
 0x54c   : > { %v1584_v60 = vmul.f32 0.7978846, %v1576_v19  ;;  %v1570_v13 = vmul.f32 0.044715, %v1562_v32 }
 0x54d   : > { %v1585_v20 = vmul.f32 0.7978846, %v1577_v35  ;;  %v1571_v29 = vmul.f32 0.044715, %v1563_v52 }
 0x54e   : > { %2693 = vtanh.f32 %v1584_v60  ;;  %v1578_v44 = vadd.f32 %v1570_v13, %v3414_v1  ;;  %v2733_v60 = vld [vmem:[%s2950_s27 + $0x8] sm:$0xff] }
 0x54f   : > { %2695 = vtanh.f32 %v1585_v20  ;;  %v1579_v36 = vadd.f32 %v1571_v29, %v1546_v15  ;;  %v1700_v13 = vrot.slane %v2733_v60, 4  ;;  %v2734_v29 = vld [vmem:[%s2950_s27] sm:$0xff]  ;;  %s2815_s27 = smov [#allocation2]  }
 0x550   : > { %v2686_v49 = vpop.eup %2685  ;;  %v1586_v51 = vmul.f32 0.7978846, %v1578_v44  ;;  %v1699_v44 = vrot.slane %v2734_v29, 4  ;;  %s2752_s22 = sshll.u32 %s2815_s27, 4  ;;  %s2753_s22 = int_to_ptr.vmem [resolvable:$false] %s2752_s22 }
 0x551   : > { %v2688_v55 = vpop.eup %2687  ;;  %v1596_v56 = vadd.f32 1.0, %v2686_v49  ;;  %v1587_v58 = vmul.f32 0.7978846, %v1579_v36  ;;  %v2742_v36 = vld [vmem:[%s3696_s2 + $0x18] sm:$0xff]  ;;  %s2754_s23 = scalar_lea.vmem %s2753_s22, 1024  ;;  %p2755_p0 = scmp.lt.s32.totalorder %s3640_s28, %s2753_s22 }
 0x552   : > { %2697 = vtanh.f32 %v1586_v51  ;;  %v1597_v61 = vadd.f32 1.0, %v2688_v55  ;;  %p2756_p1 = scmp.lt.s32.totalorder %s2754_s23, %s2748_s21 }
 0x553   : > { %2699 = vtanh.f32 %v1587_v58  ;;  %v1604_v45 = vmul.f32 0.5, %v1596_v56 }
 0x554   : > { %v2690_v62 = vpop.eup %2689  ;;  %v1605_v22 = vmul.f32 0.5, %v1597_v61  ;;  %p2757_p2 = por %p2756_p1, %p2755_p0 }
 0x555   : > { %v2692_v53 = vpop.eup %2691  ;;  %v1598_v57 = vadd.f32 1.0, %v2690_v62  ;;  %v1612_v33 = vmul.f32 %v1604_v45, %v3376_v17 }
 0x556   : > { %v1599_v5 = vadd.f32 1.0, %v2692_v53  ;;  %v1613_v7 = vmul.f32 %v1605_v22, %v3379_v34  ;;  %p2758_p3 = pnand %p2757_p2, %p2751_p13 }
 0x557   : > { %v1606_v23 = vmul.f32 0.5, %v1598_v57 }
 0x558   : > { %v2694_v24 = vpop.eup %2693  ;;  %v1607_v43 = vmul.f32 0.5, %v1599_v5 }
 0x559   : > { %v2696_v31 = vpop.eup %2695  ;;  %v1614_v38 = vmul.f32 %v1606_v23, %v3387_v41  ;;  %v1600_v6 = vadd.f32 1.0, %v2694_v24 }
 0x55a   : > { %v1615_v9 = vmul.f32 %v1607_v43, %v3391_v50  ;;  %v1601_v11 = vadd.f32 1.0, %v2696_v31 }
 0x55b   : > { %v2496_v12 = vpack.c.bf16 %v1614_v38, %v1612_v33  ;;  %v1608_v21 = vmul.f32 0.5, %v1600_v6 }
 0x55c   : > { %v2698_v18 = vpop.eup %2697  ;;  %v2494_v54 = vpack.c.bf16 %v1615_v9, %v1613_v7  ;;  %v1609_v19 = vmul.f32 0.5, %v1601_v11 }
 0x55d   : > { %v2700_v3 = vpop.eup %2699  ;;  %v1602_v59 = vadd.f32 1.0, %v2698_v18  ;;  %v1616_v32 = vmul.f32 %v1608_v21, %v3400_v63  ;;  %v2735_v63 = vld [vmem:[%s3697_s3] sm:$0xff] }
 0x55e   : > { %2495 = vmatprep.subr.bf16.mxu0 %v2494_v54  ;;  %v1603_v10 = vadd.f32 1.0, %v2700_v3  ;;  %v1617_v50 = vmul.f32 %v1609_v19, %v3405_v14  ;;  %v2739_v14 = vld [vmem:[%s3696_s2] sm:$0xff] }
 0x55f   : > { %v1610_v17 = vmul.f32 0.5, %v1602_v59  ;;  %2497 = vmatpush1.bf16.msra.mxu0 %v2496_v12 }
 0x560   : > { %v1611_v41 = vmul.f32 0.5, %v1603_v10 }
 0x561   : > { %v1618_v34 = vmul.f32 %v1610_v17, %v3414_v1  ;;  %v2740_v1 = vld [vmem:[%s3696_s2 + $0x8] sm:$0xff] }
 0x562   : > { %v1619_v35 = vmul.f32 %v1611_v41, %v1546_v15  ;;  %v2741_v15 = vld [vmem:[%s3696_s2 + $0x10] sm:$0xff] }
 0x563   : > { %v2500_v52 = vpack.c.bf16 %v1618_v34, %v1616_v32 }
 0x564   : > { %v2498_v20 = vpack.c.bf16 %v1619_v35, %v1617_v50 }
 0x566   : > { %2499 = vmatprep.subr.bf16.mxu0 %v2498_v20 }
 0x567   : > { %2501 = vmatpush1.bf16.msra.mxu0 %v2500_v52 }
 0x568   : > { %2441 = vmatprep.subr.msk.mxu0 %vm415_vm0, %v1700_v13 }
 0x56a   : > { %2440 = vmatmul.mubr.msk.f32.vlgmr.msra.gmra.mrb[16].mxu0 %vm837_vm2, %v3236_v40  ;;  %v2736_v40 = vld [vmem:[%s3697_s3 + $0x8] sm:$0xff] }
 0x56b   : > { %2442 = vmatpush1.msk.msra.mxu0 %vm415_vm0, %v1699_v44  ;;  %1769 = vmatprep.mubr.f32.mxu0 %v2813_v4 }
 0x56c   : > { %2447 = vmatprep.subr.msk.mxu0 %vm415_vm0, %v3282_v8  ;;  %v2737_v8 = vld [vmem:[%s3697_s3 + $0x10] sm:$0xff] }
 0x56e   : > { %2443 = vmatmul.mubr.msk.f32.vlgmr.msra.gmra.mrb[18].mxu0 %vm402_vm1, %v2735_v63 }
 0x56f   : > { %2448 = vmatpush1.msk.msra.mxu0 %vm415_vm0, %v3279_v2  ;;  %1775 = vmatprep.mubr.f32.mxu0 %v2813_v4  ;;  %v2738_v2 = vld [vmem:[%s3697_s3 + $0x18] sm:$0xff] }
 0x572   : > { %2444 = vmatmul.mubr.msk.f32.gmra.mrb[20].mxu0 %vm402_vm1, %v2736_v40 }
 0x573   : > { %1781 = vmatprep.mubr.f32.mxu0 %v2813_v4 }
 0x576   : > { %2445 = vmatmul.mubr.msk.f32.gmra.mrb[22].mxu0 %vm402_vm1, %v2737_v8 }
 0x577   : > { %1787 = vmatprep.mubr.f32.mxu0 %v2813_v4 }
 0x57a   : > { %2446 = vmatmul.mubr.msk.f32.gmra.mrb[24].mxu0 %vm402_vm1, %v2738_v2 }
 0x57b   : > { %1858 = vmatprep.mubr.f32.mxu0 %v2813_v4 }
 0x57e   : > { %2449 = vmatmul.mubr.msk.f32.vlgmr.msra.gmra.mrb[18].mxu0 %vm402_vm1, %v2739_v14 }
 0x57f   : > { %1864 = vmatprep.mubr.f32.mxu0 %v2813_v4 }
 0x582   : > { %2450 = vmatmul.mubr.msk.f32.gmra.mrb[20].mxu0 %vm402_vm1, %v2740_v1 }
 0x583   : > { %1870 = vmatprep.mubr.f32.mxu0 %v2813_v4 }
 0x586   : > { %2451 = vmatmul.mubr.msk.f32.gmra.mrb[22].mxu0 %vm402_vm1, %v2741_v15 }
 0x587   : > { %1876 = vmatprep.mubr.f32.mxu0 %v2813_v4 }
 0x58a   : > { %2452 = vmatmul.mubr.msk.f32.gmra.mrb[24].mxu0 %vm402_vm1, %v2742_v36 }
 0x58b   : > { %1959 = vmatprep.mubr.f32.mxu0 %v2813_v4 }
 0x63d   : > { %v1686_v49 = vpop.f32.mrb[16].mxu0 }
 0x63e   : > { %v1687_v51 = vadd.f32 %v1686_v49, %v3276_v0  ;;  %v1688_v55 = vpop.f32.mrb[17].mxu0 }
 0x63f   : > { %v1689_v56 = vadd.f32 %v1688_v55, %v3276_v0 }
 0x640   : > { %v1693_v58 = vrot.slane %v1687_v51, 4 }
 0x641   : > { %v1694_v61 = vrot.slane %v1689_v56, 4  ;;  %2453 = vmatprep.subr.msk.mxu0 %vm415_vm0, %v1689_v56 }
 0x642   : > { %1697 = vst [vmem:[%s3284_s16] sm:$0xf0] %v1693_v58  ;;  %2454 = vmatpush1.msk.msra.mxu0 %vm415_vm0, %v1687_v51 }
 0x643   : > { %1698 = vst [vmem:[%s3284_s16 + $0x8] sm:$0xf0] %v1694_v61  ;;  %2455 = vmatmul.mubr.msk.f32.vlgmr.msra.gmra.mrb[18].mxu0 %vm402_vm1, %v3049_v25 }
 0x644   : > { %1965 = vmatprep.mubr.f32.mxu0 %v2813_v4 }
 0x647   : > { %2456 = vmatmul.mubr.msk.f32.gmra.mrb[20].mxu0 %vm402_vm1, %v3054_v26 }
 0x648   : > { %1971 = vmatprep.mubr.f32.mxu0 %v2813_v4 }
 0x64b   : > { %2457 = vmatmul.mubr.msk.f32.gmra.mrb[22].mxu0 %vm402_vm1, %v3056_v27 }
 0x64c   : > { %1977 = vmatprep.mubr.f32.mxu0 %v2813_v4 }
 0x64f   : > { %2458 = vmatmul.mubr.msk.f32.gmra.mrb[24].mxu0 %vm402_vm1, %v3063_v28 }
 0x716   : > { %v1961_v62 = vpop.f32.mrb[18].mxu0 }
 0x717   : > { %v3501_v53 = vadd.f32 %v1961_v62, %v3069_v37  ;;  %v1963_v25 = vpop.f32.mrb[19].mxu0 }
 0x718   : > { %v3504_v45 = vadd.f32 %v1963_v25, %v3069_v37 }
 0x719   : > { %v1992_v26 = vmul.f32 %v3501_v53, %v3501_v53 }
 0x71a   : > { %v1993_v57 = vmul.f32 %v3504_v45, %v3504_v45  ;;  %v1967_v27 = vpop.f32.mrb[20].mxu0 }
 0x71b   : > { %v2000_v5 = vmul.f32 %v3501_v53, %v1992_v26  ;;  %v3512_v22 = vadd.f32 %v1967_v27, %v3072_v39  ;;  %v1969_v28 = vpop.f32.mrb[21].mxu0 }
 0x71c   : > { %v2001_v23 = vmul.f32 %v3504_v45, %v1993_v57  ;;  %v3516_v24 = vadd.f32 %v1969_v28, %v3072_v39 }
 0x71d   : > { %v2008_v37 = vmul.f32 0.044715, %v2000_v5  ;;  %v1994_v43 = vmul.f32 %v3512_v22, %v3512_v22 }
 0x71e   : > { %v2009_v31 = vmul.f32 0.044715, %v2001_v23  ;;  %v1995_v33 = vmul.f32 %v3516_v24, %v3516_v24  ;;  %v1973_v38 = vpop.f32.mrb[22].mxu0 }
 0x71f   : > { %v2016_v6 = vadd.f32 %v3501_v53, %v2008_v37  ;;  %v2002_v7 = vmul.f32 %v3512_v22, %v1994_v43  ;;  %v3525_v9 = vadd.f32 %v1973_v38, %v3083_v48  ;;  %v1975_v11 = vpop.f32.mrb[23].mxu0 }
 0x720   : > { %v2017_v39 = vadd.f32 %v3504_v45, %v2009_v31  ;;  %v2003_v12 = vmul.f32 %v3516_v24, %v1995_v33  ;;  %v3530_v18 = vadd.f32 %v1975_v11, %v3083_v48 }
 0x721   : > { %v2024_v54 = vmul.f32 0.7978846, %v2016_v6  ;;  %v2010_v3 = vmul.f32 0.044715, %v2002_v7  ;;  %v1996_v21 = vmul.f32 %v3525_v9, %v3525_v9 }
 0x722   : > { %v2025_v59 = vmul.f32 0.7978846, %v2017_v39  ;;  %v2011_v10 = vmul.f32 0.044715, %v2003_v12  ;;  %v1997_v19 = vmul.f32 %v3530_v18, %v3530_v18  ;;  %v1979_v17 = vpop.f32.mrb[24].mxu0 }
 0x723   : > { %2701 = vtanh.f32 %v2024_v54  ;;  %v2018_v41 = vadd.f32 %v3512_v22, %v2010_v3  ;;  %v2004_v32 = vmul.f32 %v3525_v9, %v1996_v21  ;;  %v3539_v34 = vadd.f32 %v1979_v17, %v3103_v16  ;;  %v1981_v48 = vpop.f32.mrb[25].mxu0 }
 0x724   : > { %2703 = vtanh.f32 %v2025_v59  ;;  %v2019_v50 = vadd.f32 %v3516_v24, %v2011_v10  ;;  %v2005_v35 = vmul.f32 %v3530_v18, %v1997_v19  ;;  %v2549_v52 = vadd.f32 %v1981_v48, %v3103_v16 }
 0x725   : > { %v2026_v60 = vmul.f32 0.7978846, %v2018_v41  ;;  %v2012_v13 = vmul.f32 0.044715, %v2004_v32  ;;  %v1998_v20 = vmul.f32 %v3539_v34, %v3539_v34 }
 0x726   : > { %v2027_v29 = vmul.f32 0.7978846, %v2019_v50  ;;  %v2013_v44 = vmul.f32 0.044715, %v2005_v35  ;;  %v1999_v63 = vmul.f32 %v2549_v52, %v2549_v52 }
 0x727   : > { %2705 = vtanh.f32 %v2026_v60  ;;  %v2020_v40 = vadd.f32 %v3525_v9, %v2012_v13  ;;  %v2006_v8 = vmul.f32 %v3539_v34, %v1998_v20  ;;  %v2743_v60 = vld [vmem:[%s3699_s5] sm:$0xff] }
 0x728   : > { %2707 = vtanh.f32 %v2027_v29  ;;  %v2021_v2 = vadd.f32 %v3530_v18, %v2013_v44  ;;  %v2007_v14 = vmul.f32 %v2549_v52, %v1999_v63 }
 0x729   : > { %v2028_v1 = vmul.f32 0.7978846, %v2020_v40  ;;  %v2014_v15 = vmul.f32 0.044715, %v2006_v8 }
 0x72a   : > { %v2029_v16 = vmul.f32 0.7978846, %v2021_v2  ;;  %v2015_v36 = vmul.f32 0.044715, %v2007_v14 }
 0x72b   : > { %2709 = vtanh.f32 %v2028_v1  ;;  %v2022_v49 = vadd.f32 %v3539_v34, %v2014_v15 }
 0x72c   : > { %2711 = vtanh.f32 %v2029_v16  ;;  %v2023_v51 = vadd.f32 %v2549_v52, %v2015_v36 }
 0x72d   : > { %v2702_v55 = vpop.eup %2701  ;;  %v2030_v56 = vmul.f32 0.7978846, %v2022_v49 }
 0x72e   : > { %v2704_v58 = vpop.eup %2703  ;;  %v2040_v61 = vadd.f32 1.0, %v2702_v55  ;;  %v2031_v62 = vmul.f32 0.7978846, %v2023_v51 }
 0x72f   : > { %2713 = vtanh.f32 %v2030_v56  ;;  %v2041_v25 = vadd.f32 1.0, %v2704_v58 }
 0x730   : > { %2715 = vtanh.f32 %v2031_v62  ;;  %v2048_v27 = vmul.f32 0.5, %v2040_v61 }
 0x731   : > { %v2706_v26 = vpop.eup %2705  ;;  %v2049_v23 = vmul.f32 0.5, %v2041_v25 }
 0x732   : > { %v2708_v57 = vpop.eup %2707  ;;  %v2042_v5 = vadd.f32 1.0, %v2706_v26  ;;  %v2056_v38 = vmul.f32 %v3501_v53, %v2048_v27 }
 0x733   : > { %v2043_v28 = vadd.f32 1.0, %v2708_v57  ;;  %v2057_v11 = vmul.f32 %v3504_v45, %v2049_v23 }
 0x734   : > { %v2050_v37 = vmul.f32 0.5, %v2042_v5 }
 0x735   : > { %v2710_v43 = vpop.eup %2709  ;;  %v2051_v31 = vmul.f32 0.5, %v2043_v28 }
 0x736   : > { %v2712_v33 = vpop.eup %2711  ;;  %v2058_v6 = vmul.f32 %v3512_v22, %v2050_v37  ;;  %v2044_v7 = vadd.f32 1.0, %v2710_v43 }
 0x737   : > { %v2059_v39 = vmul.f32 %v3516_v24, %v2051_v31  ;;  %v2045_v12 = vadd.f32 1.0, %v2712_v33 }
 0x738   : > { %v2504_v54 = vpack.c.bf16 %v2058_v6, %v2056_v38  ;;  %v2052_v10 = vmul.f32 0.5, %v2044_v7 }
 0x739   : > { %v2714_v3 = vpop.eup %2713  ;;  %v2502_v21 = vpack.c.bf16 %v2059_v39, %v2057_v11  ;;  %v2053_v41 = vmul.f32 0.5, %v2045_v12 }
 0x73a   : > { %v2716_v59 = vpop.eup %2715  ;;  %v2046_v19 = vadd.f32 1.0, %v2714_v3  ;;  %v2060_v22 = vmul.f32 %v3525_v9, %v2052_v10  ;;  %v2744_v9 = vld [vmem:[%s3699_s5 + $0x8] sm:$0xff] }
 0x73b   : > { %2503 = vmatprep.subr.bf16.mxu1 %v2502_v21  ;;  %v2047_v17 = vadd.f32 1.0, %v2716_v59  ;;  %v2061_v45 = vmul.f32 %v3530_v18, %v2053_v41  ;;  %v2745_v18 = vld [vmem:[%s3699_s5 + $0x10] sm:$0xff] }
 0x73c   : > { %v2054_v32 = vmul.f32 0.5, %v2046_v19  ;;  %2505 = vmatpush1.bf16.msra.mxu1 %v2504_v54 }
 0x73d   : > { %v2055_v53 = vmul.f32 0.5, %v2047_v17 }
 0x73e   : > { %v2062_v48 = vmul.f32 %v3539_v34, %v2054_v32  ;;  %v2746_v34 = vld [vmem:[%s3699_s5 + $0x18] sm:$0xff] }
 0x73f   : > { %v2063_v24 = vmul.f32 %v2549_v52, %v2055_v53 }
 0x740   : > { %v2508_v50 = vpack.c.bf16 %v2062_v48, %v2060_v22 }
 0x741   : > { %v2506_v35 = vpack.c.bf16 %v2063_v24, %v2061_v45 }
 0x743   : > { %2507 = vmatprep.subr.bf16.mxu1 %v2506_v35 }
 0x744   : > { %2509 = vmatpush1.bf16.msra.mxu1 %v2508_v50 }
 0x747   : > { %2459 = vmatmul.mubr.msk.f32.vlgmr.msra.gmra.mrb[26].mxu1 %vm837_vm2, %v2743_v60 }
 0x748   : > { %2134 = vmatprep.mubr.f32.mxu1 %v2813_v4 }
 0x74b   : > { %2460 = vmatmul.mubr.msk.f32.gmra.mrb[28].mxu1 %vm837_vm2, %v2744_v9 }
 0x74c   : > { %2140 = vmatprep.mubr.f32.mxu1 %v2813_v4 }
 0x74f   : > { %2461 = vmatmul.mubr.msk.f32.gmra.mrb[30].mxu1 %vm837_vm2, %v2745_v18 }
 0x750   : > { %2146 = vmatprep.mubr.f32.mxu1 %v2813_v4 }
 0x753   : > { %2462 = vmatmul.mubr.msk.f32.gmra.mrb[32].mxu1 %vm837_vm2, %v2746_v34 }
 0x754   : > { %2289 = vmatprep.mubr.f32.mxu1 %v2813_v4 }
 0x81a   : > { %v2130_v52 = vpop.f32.mrb[26].mxu1 }
 0x81b   : > { %v3578_v13 = vadd.f32 %v2130_v52, %v3166_v46  ;;  %v2132_v20 = vpop.f32.mrb[27].mxu1 }
 0x81c   : > { %v3581_v29 = vadd.f32 %v2132_v20, %v3166_v46 }
 0x81d   : > { %v2153_v44 = vmul.f32 %v3578_v13, %v3578_v13 }
 0x81e   : > { %v2154_v63 = vmul.f32 %v3581_v29, %v3581_v29  ;;  %v2136_v40 = vpop.f32.mrb[28].mxu1 }
 0x81f   : > { %v2161_v8 = vmul.f32 %v2153_v44, %v3578_v13  ;;  %v3589_v2 = vadd.f32 %v2136_v40, %v3176_v30  ;;  %v2138_v4 = vpop.f32.mrb[29].mxu1 }
 0x820   : > { %v2162_v14 = vmul.f32 %v2154_v63, %v3581_v29  ;;  %v3593_v1 = vadd.f32 %v2138_v4, %v3176_v30 }
 0x821   : > { %v2169_v46 = vmul.f32 0.044715, %v2161_v8  ;;  %v2155_v15 = vmul.f32 %v3589_v2, %v3589_v2 }
 0x822   : > { %v2170_v16 = vmul.f32 0.044715, %v2162_v14  ;;  %v2156_v36 = vmul.f32 %v3593_v1, %v3593_v1  ;;  %v2142_v49 = vpop.f32.mrb[30].mxu1 }
 0x823   : > { %v2177_v51 = vadd.f32 %v2169_v46, %v3578_v13  ;;  %v2163_v55 = vmul.f32 %v2155_v15, %v3589_v2  ;;  %v3602_v56 = vadd.f32 %v2142_v49, %v3190_v47  ;;  %v2144_v58 = vpop.f32.mrb[31].mxu1 }
 0x824   : > { %v2178_v30 = vadd.f32 %v2170_v16, %v3581_v29  ;;  %v2164_v61 = vmul.f32 %v2156_v36, %v3593_v1  ;;  %v3607_v62 = vadd.f32 %v2144_v58, %v3190_v47 }
 0x825   : > { %v2185_v25 = vmul.f32 0.7978846, %v2177_v51  ;;  %v2171_v26 = vmul.f32 0.044715, %v2163_v55  ;;  %v2157_v57 = vmul.f32 %v3602_v56, %v3602_v56 }
 0x826   : > { %v2186_v27 = vmul.f32 0.7978846, %v2178_v30  ;;  %v2172_v5 = vmul.f32 0.044715, %v2164_v61  ;;  %v2158_v28 = vmul.f32 %v3607_v62, %v3607_v62  ;;  %v2148_v23 = vpop.f32.mrb[32].mxu1 }
 0x827   : > { %2717 = vtanh.f32 %v2185_v25  ;;  %v2179_v37 = vadd.f32 %v2171_v26, %v3589_v2  ;;  %v2165_v43 = vmul.f32 %v2157_v57, %v3602_v56  ;;  %v3616_v31 = vadd.f32 %v2148_v23, %v3206_v42  ;;  %v2150_v47 = vpop.f32.mrb[33].mxu1 }
 0x828   : > { %2719 = vtanh.f32 %v2186_v27  ;;  %v2180_v33 = vadd.f32 %v2172_v5, %v3593_v1  ;;  %v2166_v38 = vmul.f32 %v2158_v28, %v3607_v62  ;;  %v2151_v6 = vadd.f32 %v2150_v47, %v3206_v42 }
 0x829   : > { %v2187_v7 = vmul.f32 0.7978846, %v2179_v37  ;;  %v2173_v11 = vmul.f32 0.044715, %v2165_v43  ;;  %v2159_v39 = vmul.f32 %v3616_v31, %v3616_v31  ;;  %v2747_v37 = vld [vmem:[%s3701_s7] sm:$0xf] }
 0x82a   : > { %v2188_v12 = vmul.f32 0.7978846, %v2180_v33  ;;  %v2174_v54 = vmul.f32 0.044715, %v2166_v38  ;;  %v2160_v3 = vmul.f32 %v2151_v6, %v2151_v6 }
 0x82b   : > { %2721 = vtanh.f32 %v2187_v7  ;;  %v2181_v21 = vadd.f32 %v2173_v11, %v3602_v56  ;;  %v2167_v59 = vmul.f32 %v2159_v39, %v3616_v31 }
 0x82c   : > { %2723 = vtanh.f32 %v2188_v12  ;;  %v2182_v10 = vadd.f32 %v2174_v54, %v3607_v62  ;;  %v2168_v19 = vmul.f32 %v2160_v3, %v2151_v6 }
 0x82d   : > { %v2189_v17 = vmul.f32 0.7978846, %v2181_v21  ;;  %v2175_v41 = vmul.f32 0.044715, %v2167_v59 }
 0x82e   : > { %v2190_v42 = vmul.f32 0.7978846, %v2182_v10  ;;  %v2176_v32 = vmul.f32 0.044715, %v2168_v19 }
 0x82f   : > { %2725 = vtanh.f32 %v2189_v17  ;;  %v2183_v53 = vadd.f32 %v2175_v41, %v3616_v31 }
 0x830   : > { %2727 = vtanh.f32 %v2190_v42  ;;  %v2184_v22 = vadd.f32 %v2176_v32, %v2151_v6 }
 0x831   : > { %v2718_v48 = vpop.eup %2717  ;;  %v2191_v45 = vmul.f32 0.7978846, %v2183_v53 }
 0x832   : > { %v2720_v24 = vpop.eup %2719  ;;  %v2201_v50 = vadd.f32 1.0, %v2718_v48  ;;  %v2192_v35 = vmul.f32 0.7978846, %v2184_v22 }
 0x833   : > { %2729 = vtanh.f32 %v2191_v45  ;;  %v2202_v60 = vadd.f32 1.0, %v2720_v24 }
 0x834   : > { %2731 = vtanh.f32 %v2192_v35  ;;  %v2209_v34 = vmul.f32 0.5, %v2201_v50 }
 0x835   : > { %v2722_v9 = vpop.eup %2721  ;;  %v2210_v44 = vmul.f32 0.5, %v2202_v60 }
 0x836   : > { %v2724_v18 = vpop.eup %2723  ;;  %v2203_v52 = vadd.f32 1.0, %v2722_v9  ;;  %v2217_v14 = vmul.f32 %v2209_v34, %v3578_v13 }
 0x837   : > { %v2204_v20 = vadd.f32 1.0, %v2724_v18  ;;  %v2218_v16 = vmul.f32 %v2210_v44, %v3581_v29 }
 0x838   : > { %v2211_v63 = vmul.f32 0.5, %v2203_v52 }
 0x839   : > { %v2726_v40 = vpop.eup %2725  ;;  %v2212_v8 = vmul.f32 0.5, %v2204_v20 }
 0x83a   : > { %v2728_v4 = vpop.eup %2727  ;;  %v2219_v46 = vmul.f32 %v2211_v63, %v3589_v2  ;;  %v2205_v15 = vadd.f32 1.0, %v2726_v40 }
 0x83b   : > { %v2220_v36 = vmul.f32 %v2212_v8, %v3593_v1  ;;  %v2206_v49 = vadd.f32 1.0, %v2728_v4 }
 0x83c   : > { %v2512_v51 = vpack.c.bf16 %v2219_v46, %v2217_v14  ;;  %v2213_v61 = vmul.f32 0.5, %v2205_v15 }
 0x83d   : > { %v2730_v55 = vpop.eup %2729  ;;  %v2510_v58 = vpack.c.bf16 %v2220_v36, %v2218_v16  ;;  %v2214_v57 = vmul.f32 0.5, %v2206_v49 }
 0x83e   : > { %v2732_v30 = vpop.eup %2731  ;;  %v2207_v25 = vadd.f32 1.0, %v2730_v55  ;;  %v2221_v27 = vmul.f32 %v2213_v61, %v3602_v56 }
 0x83f   : > { %2511 = vmatprep.subr.bf16.mxu1 %v2510_v58  ;;  %v2208_v26 = vadd.f32 1.0, %v2732_v30  ;;  %v2222_v1 = vmul.f32 %v2214_v57, %v3607_v62 }
 0x840   : > { %v2215_v13 = vmul.f32 0.5, %v2207_v25  ;;  %2513 = vmatpush1.bf16.msra.mxu1 %v2512_v51 }
 0x841   : > { %v2216_v2 = vmul.f32 0.5, %v2208_v26 }
 0x842   : > { %v2223_v29 = vmul.f32 %v2215_v13, %v3616_v31 }
 0x843   : > { %v2224_v5 = vmul.f32 %v2216_v2, %v2151_v6 }
 0x844   : > { %v2516_v28 = vpack.c.bf16 %v2223_v29, %v2221_v27 }
 0x845   : > { %v2514_v23 = vpack.c.bf16 %v2224_v5, %v2222_v1 }
 0x847   : > { %2515 = vmatprep.subr.bf16.mxu1 %v2514_v23 }
 0x848   : > { %2517 = vmatpush1.bf16.msra.mxu1 %v2516_v28 }
 0x84b   : > { %2463 = vmatmul.mubr.msk.f32.vlgmr.msra.gmra.mrb[34].mxu1 %vm837_vm2, %v2747_v37 }
 0x91e   : > { %v2291_v56 = vpop.f32.mrb[34].mxu1 }
 0x91f   : > { %v2292_v62 = vadd.f32 %v2291_v56, %v3276_v0  ;;  %v2293_v43 = vpop.f32.mrb[35].mxu1 }
 0x920   : > { %v2294_v31 = vadd.f32 %v2293_v43, %v3276_v0 }
 0x921   : > { %2296 = vst [vmem:[%s3284_s16 + $0x10] sm:$0xf] %v2292_v62 }
 0x922   : > { %2297 = vst [vmem:[%s3284_s16 + $0x18] sm:$0xf] %v2294_v31 }
 0x923   : > { %2761 = shalt.err (!%p2758_p3)
}
 0x924   : > { %s2762_s26 = scalar_lea.hbm %s3646_s17, 512  ;;  %s2766_s29 = scalar_lea.hbm %s3703_s9, 1024 }
 0x925   : > { %p2763_p4 = scmp.ne.s32.totalorder %s3646_s17, %s2762_s26  ;;  %p2767_p9 = scmp.lt.u32.totalorder %s3646_s17, %s3703_s9 }
 0x926   : > { %p2768_p10 = scmp.lt.u32.totalorder %s2766_s29, %s2762_s26  ;;  %p2770_p12 = scmp.lt.u32.totalorder %s2762_s26, %s3646_s17 }
 0x927   : > { %p2764_p7 = pnand %p2763_p4, %p2907_p5 }
 0x928   : > { %p2769_p11 = por %p2768_p10, %p2767_p9 }
 0x929   : > { %p2765_p8 = pneg %p2764_p7 }
 0x92a   : > { %p2771_p13 = por %p2770_p12, %p2769_p11 }
 0x92c   : > { %p2772_p0 = pnand %p2771_p13, %p2765_p8 }
 0x92e   : > { %2775 = shalt.err (!%p2772_p0)
}
 0x92f   : > { %s2816_s21 = smov 256   ;;  %s2817_s27 = smov 512  }
 0x930   : > { %s2818_s22 = smov 16  }
 0x931   : > { %2590 = dma.vmem_to_hbm [thread:$0]  (%p2907_p5), %s3640_s28, 512, %s3646_s17, %s3653_s13, %s2816_s21, %s2817_s27, %s2818_s22  }
 0x932 PF: > { %p2596_p1 = scmp.ge.s32.totalorder %s2810_s12, 2  ;;  %s2327_s23 = sand.u32 1, %s2798_s30  }
 0x933   : > { %s2328_s26 = scalar_lea.sflag [#allocation3], %s2327_s23 }
 0x934   : > { %p2593_p2 = pnand %p2596_p1, %p2911_p6 }
 0x936   : > { %2793 = dma.done.wait (!%p2593_p2), %s2328_s26, 512  }
 0x937   : > { %2795 = vsyncadd (!%p2593_p2), %s2328_s26, 4294966784  ;;  %p19_p3 = scmp.ge.s32.totalorder %s2894_s15, 4   ;;  %s3706_s30 = smov %s2802_s10 }
 0x938   : > { %s3707_s10 = smov %s2806_s11  ;;  %s3708_s11 = smov %s2905_s18 }
 0x939   : > { %s3709_s12 = smov %s2894_s15  ;;  %21 = sbr.rel (!%p19_p3) target bundleno = 3 (0x3), region = 94 }
 0x940   :  { %2333 = vsyncpa [#allocation3], 1 }
 0x941   :  { %2335 = vsyncpa [#allocation3 + $0x1], 1 }

</bundles_post_ra>
